<compile_context>
chip_gen: v6e
topology: v6e:2x2x1
jax: 0.10.0
libtpu: 0.0.40
codegen_flags: <defaults>
</compile_context>

<pallas_src>
import functools
import math

import numpy as np
import jax
import jax.numpy as jnp
from jax.experimental import pallas as pl
from jax.experimental.pallas import tpu as pltpu

# ----- torchaudio MFCC default configuration -----
SAMPLE_RATE = 16000
N_FFT = 400
HOP = N_FFT // 2            # 200
PAD = N_FFT // 2            # center padding (reflect)
N_FREQ = N_FFT // 2 + 1     # 201 (onesided)
FREQ_PAD = 256              # lane-aligned padded freq count
N_MELS = 128
N_MFCC = 40
TOP_DB = 80.0
AMIN = 1e-10
# db_multiplier = log10(max(amin, ref_value=1.0)) = 0.0 -> no offset term.


def _round_up(x, m):
    return ((x + m - 1) // m) * m


def _default_tile_f():
    # v6e/v7x: 1024-frame tiles amortize the ~0.35us/grid-step overhead while the
    # per-step working set (~10-12 MB) stays well under the 32 MiB scoped VMEM
    # limit (safe even on v7x's 64 MiB physical VMEM).
    # v5e: stay at 512 so the f32 DFT/power temporaries don't saturate its single
    # vector-store slot.
    try:
        kind = jax.devices()[0].device_kind.lower()
    except Exception:
        return 1024
    return 512 if "v5" in kind else 1024


TILE_F_DEFAULT = _default_tile_f()


# ----------------- deterministic parameter construction (host) -----------------
def _hann_window(n):
    i = np.arange(n, dtype=np.float64)
    return 0.5 - 0.5 * np.cos(2.0 * np.pi * i / n)            # periodic hann (torch default)


def _fused_dft_basis():
    """Windowed DFT basis (N_FFT, 2*FREQ_PAD): cos in lanes [0,201), -sin in lanes
    [256, 457), zero elsewhere; returned split into the two window halves so the
    kernel never has to lane-concatenate the two frame halves."""
    w = _hann_window(N_FFT)
    n = np.arange(N_FFT, dtype=np.float64)[:, None]
    k = np.arange(N_FREQ, dtype=np.float64)[None, :]
    ang = 2.0 * np.pi * n * k / N_FFT
    basis = np.zeros((N_FFT, 2 * FREQ_PAD), dtype=np.float64)
    basis[:, :N_FREQ] = w[:, None] * np.cos(ang)
    basis[:, FREQ_PAD:FREQ_PAD + N_FREQ] = -w[:, None] * np.sin(ang)
    btop = jnp.asarray(basis[:HOP], dtype=jnp.bfloat16)       # (200, 512)
    bbot = jnp.asarray(basis[HOP:], dtype=jnp.bfloat16)       # (200, 512)
    return btop, bbot


def _mel_fbanks_htk_padded():
    all_freqs = np.linspace(0.0, SAMPLE_RATE // 2, N_FREQ)
    hz2mel = lambda f: 2595.0 * np.log10(1.0 + f / 700.0)
    mel2hz = lambda m: 700.0 * (10.0 ** (m / 2595.0) - 1.0)
    m_pts = np.linspace(hz2mel(0.0), hz2mel(float(SAMPLE_RATE // 2)), N_MELS + 2)
    f_pts = mel2hz(m_pts)
    f_diff = f_pts[1:] - f_pts[:-1]
    slopes = f_pts[None, :] - all_freqs[:, None]              # (201, 130)
    down = -slopes[:, :-2] / f_diff[:-1]
    up = slopes[:, 2:] / f_diff[1:]
    fb = np.maximum(0.0, np.minimum(down, up))                # (201, 128)
    fb_pad = np.zeros((FREQ_PAD, N_MELS), dtype=np.float64)
    fb_pad[:N_FREQ] = fb
    return jnp.asarray(fb_pad, dtype=jnp.bfloat16)            # (256, 128)


def _dct_t_ortho():
    """torchaudio create_dct(n_mfcc, n_mels, 'ortho'), transposed: (n_mfcc, n_mels)."""
    n = np.arange(N_MELS, dtype=np.float64)[None, :]
    k = np.arange(N_MFCC, dtype=np.float64)[:, None]
    d = np.cos(np.pi / N_MELS * (n + 0.5) * k)                # (40, 128)
    d[0] *= 1.0 / math.sqrt(2.0)
    d *= math.sqrt(2.0 / N_MELS)
    return jnp.asarray(d, dtype=jnp.float32)


# ------------------------------- Pallas kernels -------------------------------
def _melspec_db_kernel(a_ref, b_ref, btop_ref, bbot_ref, fb_ref,
                       mel_db_ref, blkmax_ref, *, n_frames):
    # a_ref / b_ref: (1, TILE_F, HOP) f32 -- per-tile frame halves only (frame r of
    # this tile = [a[r], b[r]]; b is the one-chunk-shifted view built in XLA), so
    # VMEM usage is clip-length independent and no shifted slab copy is needed.
    # btop/bbot : (HOP, 2*FREQ_PAD) bf16   (fused cos|-sin basis, window halves)
    # fb_ref    : (FREQ_PAD, N_MELS) bf16
    tile_f = a_ref.shape[1]
    left = a_ref[0].astype(jnp.bfloat16)
    right = b_ref[0].astype(jnp.bfloat16)

    # Windowed real DFT as two MXU matmuls into one fused (cos|sin) result.
    d = jnp.dot(left, btop_ref[...], preferred_element_type=jnp.float32)
    d = d + jnp.dot(right, bbot_ref[...], preferred_element_type=jnp.float32)
    re = d[:, :FREQ_PAD]                                       # 128-lane aligned slices
    im = d[:, FREQ_PAD:]
    power = re * re + im * im                                  # (TILE_F, 256) f32

    mel = jnp.dot(power.astype(jnp.bfloat16), fb_ref[...],
                  preferred_element_type=jnp.float32)          # (TILE_F, 128)
    # AmplitudeToDB ('power'): 10*log10(clamp(x, amin)) - 10*db_multiplier (== 0)
    mel_db = 10.0 * jnp.log10(jnp.maximum(mel, AMIN))
    mel_db_ref[0] = mel_db.astype(jnp.bfloat16)                # bf16 intermediate

    j = pl.program_id(1)
    is_last = j == pl.num_programs(1) - 1

    # Per-tile max so the top_db floor never needs a second HBM pass over mel_db.
    # The valid-frame mask (padded tail frames) is only needed on the last tile.
    @pl.when(is_last)
    def _():
        row = jax.lax.broadcasted_iota(jnp.int32, (tile_f, N_MELS), 0) + j * tile_f
        masked = jnp.where(row < n_frames, mel_db, -1e30)
        blkmax_ref[0, 0] = jnp.broadcast_to(
            jnp.max(masked, axis=0, keepdims=True), (8, N_MELS))

    @pl.when(jnp.logical_not(is_last))
    def _():
        blkmax_ref[0, 0] = jnp.broadcast_to(
            jnp.max(mel_db, axis=0, keepdims=True), (8, N_MELS))


def _dct_kernel(maxs_ref, mel_db_ref, dct_ref, out_ref):
    # maxs_ref: (B,) f32 in SMEM  (per-spectrogram max of mel_db)
    b = pl.program_id(0)
    floor = maxs_ref[b] - TOP_DB                               # top_db clamp floor
    mel = jnp.maximum(mel_db_ref[0].astype(jnp.float32), floor)   # (TILE_F2, 128)
    # DCT-II ('ortho') as (n_mfcc, n_mels) x (TILE_F2, n_mels)^T: lane-dense output,
    # already in the final (..., n_mfcc, time) layout.
    out_ref[0] = jax.lax.dot_general(
        dct_ref[...], mel, (((1,), (1,)), ((), ())),
        preferred_element_type=jnp.float32)                    # (40, TILE_F2)


# --------------------------------- wrapper ------------------------------------
@jax.jit
def mfcc_forward(waveform, btop, bbot, fb, dct_t):
    """waveform: (B, T) float32 -> mfcc: (B, n_mfcc, n_frames) float32."""
    B, T = waveform.shape
    n_frames = 1 + T // HOP
    tile_f = min(TILE_F_DEFAULT, _round_up(n_frames, 128))
    n_tiles = (n_frames + tile_f - 1) // tile_f
    n_frames_pad = n_tiles * tile_f

    # Center (reflect) padding as in torch.stft (requires T > PAD), then zero-pad so
    # both chunk views below cover whole tiles.
    total = max((n_frames_pad + 1) * HOP, T + 2 * PAD)
    padded = jnp.pad(waveform, ((0, 0), (PAD, PAD)), mode="reflect")
    padded = jnp.pad(padded, ((0, 0), (0, total - padded.shape[1])))
    # Two per-frame chunk views: frame r = [chunks_a[r], chunks_b[r]] (chunks_b is the
    # one-HOP-shifted twin).  Only (1, tile_f, HOP) blocks of each are DMA'd per grid
    # step, so the frame axis pipelines HBM DMA against MXU compute.
    chunks_a = padded[:, :n_frames_pad * HOP].reshape(B, n_frames_pad, HOP)
    chunks_b = padded[:, HOP:(n_frames_pad + 1) * HOP].reshape(B, n_frames_pad, HOP)

    # Kernel 1: frames -> windowed DFT -> power -> mel -> dB (+ per-tile max).
    mel_db, blkmax = pl.pallas_call(
        functools.partial(_melspec_db_kernel, n_frames=n_frames),
        out_shape=(
            jax.ShapeDtypeStruct((B, n_frames_pad, N_MELS), jnp.bfloat16),
            jax.ShapeDtypeStruct((B, n_tiles, 8, N_MELS), jnp.float32),
        ),
        grid_spec=pl.GridSpec(
            grid=(B, n_tiles),
            in_specs=[
                pl.BlockSpec((1, tile_f, HOP), lambda b, j: (b, j, 0)),
                pl.BlockSpec((1, tile_f, HOP), lambda b, j: (b, j, 0)),
                pl.BlockSpec((HOP, 2 * FREQ_PAD), lambda b, j: (0, 0)),
                pl.BlockSpec((HOP, 2 * FREQ_PAD), lambda b, j: (0, 0)),
                pl.BlockSpec((FREQ_PAD, N_MELS), lambda b, j: (0, 0)),
            ],
            out_specs=[
                pl.BlockSpec((1, tile_f, N_MELS), lambda b, j: (b, j, 0)),
                pl.BlockSpec((1, 1, 8, N_MELS), lambda b, j: (b, j, 0, 0)),
            ],
        ),
        compiler_params=pltpu.CompilerParams(
            dimension_semantics=("parallel", "parallel"),
            vmem_limit_bytes=32 * 1024 * 1024),
    )(chunks_a, chunks_b, btop, bbot, fb)

    # Per-spectrogram max for the top_db clamp: tiny reduction over the per-tile
    # maxima (mel_db itself is never re-read from HBM for this).
    batch_max = jnp.max(blkmax, axis=(1, 2, 3))                # (B,) f32

    # Kernel 2: top_db clamp + DCT-II, lane-dense (n_mfcc, time) output.  HBM-bound
    # epilogue, so it gets its own, larger time tile to amortize per-step overhead.
    if n_frames_pad % 2048 == 0:
        tile_f2 = 2048
    elif n_frames_pad % 1024 == 0:
        tile_f2 = 1024
    else:
        tile_f2 = tile_f
    n_tiles2 = n_frames_pad // tile_f2

    mfcc_pad = pl.pallas_call(
        _dct_kernel,
        out_shape=jax.ShapeDtypeStruct((B, N_MFCC, n_frames_pad), jnp.float32),
        grid_spec=pl.GridSpec(
            grid=(B, n_tiles2),
            in_specs=[
                pl.BlockSpec(memory_space=pltpu.MemorySpace.SMEM),
                pl.BlockSpec((1, tile_f2, N_MELS), lambda b, j: (b, j, 0)),
                pl.BlockSpec((N_MFCC, N_MELS), lambda b, j: (0, 0)),
            ],
            out_specs=pl.BlockSpec((1, N_MFCC, tile_f2), lambda b, j: (b, 0, j)),
        ),
        compiler_params=pltpu.CompilerParams(
            dimension_semantics=("parallel", "parallel"),
            vmem_limit_bytes=32 * 1024 * 1024),
    )(batch_max, mel_db, dct_t)

    # Drop the padded tail frames; output is already (..., n_mfcc, time).
    return mfcc_pad[:, :, :n_frames]


if __name__ == "__main__":
    # Deterministic parameter / buffer construction (synthetic, no checkpoint).
    btop, bbot = _fused_dft_basis()
    fb = _mel_fbanks_htk_padded()
    dct_t = _dct_t_ortho()

    # Small deterministic input: 2 channels, 1024 samples of audio.
    key = jax.random.PRNGKey(0)
    waveform = jax.random.normal(key, (2, 1024), dtype=jnp.float32)

    mfcc = mfcc_forward(waveform, btop, bbot, fb, dct_t)
    mfcc = jax.block_until_ready(mfcc)

    expected_frames = 1 + 1024 // HOP          # 6
    assert mfcc.shape == (2, N_MFCC, expected_frames), mfcc.shape
    assert bool(jnp.all(jnp.isfinite(mfcc)))
    print("KERNEL_OK")
</pallas_src>

<mosaic_0001>
module attributes {stable_mosaic.version = 11 : i64} {
  func.func @_melspec_db_kernel(%arg0: i32, %arg1: i32, %arg2: memref<1x128x200xf32, #tpu.memory_space<vmem>>, %arg3: memref<1x128x200xf32, #tpu.memory_space<vmem>>, %arg4: memref<200x512xbf16, #tpu.memory_space<vmem>>, %arg5: memref<200x512xbf16, #tpu.memory_space<vmem>>, %arg6: memref<256x128xbf16, #tpu.memory_space<vmem>>, %arg7: memref<1x128x128xbf16, #tpu.memory_space<vmem>>, %arg8: memref<1x1x8x128xf32, #tpu.memory_space<vmem>>) attributes {dimension_semantics = [#tpu.dimension_semantics<parallel>, #tpu.dimension_semantics<parallel>], iteration_bounds = array<i64: 2, 1>, scalar_prefetch = 0 : i64, scratch_operands = 0 : i64, tpu.core_type = #tpu.core_type<tc>, window_params = [{transform_indices = @transform_0, window_bounds = array<i64: 1, 128, 200>}, {transform_indices = @transform_1, window_bounds = array<i64: 1, 128, 200>}, {pipeline_mode = #tpu.pipeline_mode<synchronous>, transform_indices = @transform_2, window_bounds = array<i64: 200, 512>}, {pipeline_mode = #tpu.pipeline_mode<synchronous>, transform_indices = @transform_3, window_bounds = array<i64: 200, 512>}, {pipeline_mode = #tpu.pipeline_mode<synchronous>, transform_indices = @transform_4, window_bounds = array<i64: 256, 128>}, {transform_indices = @transform_5, window_bounds = array<i64: 1, 128, 128>}, {transform_indices = @transform_6, window_bounds = array<i64: 1, 1, 8, 128>}]} {
    %c0 = arith.constant 0 : index
    %c0_0 = arith.constant 0 : index
    %c0_1 = arith.constant 0 : index
    %0 = vector.load %arg2[%c0, %c0_0, %c0_1] : memref<1x128x200xf32, #tpu.memory_space<vmem>>, vector<1x128x200xf32>
    %1 = vector.shape_cast %0 : vector<1x128x200xf32> to vector<128x200xf32>
    %2 = arith.truncf %1 : vector<128x200xf32> to vector<128x200xbf16>
    %c0_2 = arith.constant 0 : index
    %c0_3 = arith.constant 0 : index
    %c0_4 = arith.constant 0 : index
    %3 = vector.load %arg3[%c0_2, %c0_3, %c0_4] : memref<1x128x200xf32, #tpu.memory_space<vmem>>, vector<1x128x200xf32>
    %4 = vector.shape_cast %3 : vector<1x128x200xf32> to vector<128x200xf32>
    %5 = arith.truncf %4 : vector<128x200xf32> to vector<128x200xbf16>
    %c0_5 = arith.constant 0 : index
    %c0_6 = arith.constant 0 : index
    %6 = vector.load %arg4[%c0_5, %c0_6] : memref<200x512xbf16, #tpu.memory_space<vmem>>, vector<200x512xbf16>
    %cst = arith.constant dense<0.000000e+00> : vector<128x512xf32>
    %7 = tpu.matmul %2, %6, %cst {dimension_numbers = #tpu.dot_dimension_numbers<[1], [0], [0], [1], [0, 0, 1, 1], [], []>} : vector<128x200xbf16>, vector<200x512xbf16>, vector<128x512xf32> -> vector<128x512xf32>
    %c0_7 = arith.constant 0 : index
    %c0_8 = arith.constant 0 : index
    %8 = vector.load %arg5[%c0_7, %c0_8] : memref<200x512xbf16, #tpu.memory_space<vmem>>, vector<200x512xbf16>
    %cst_9 = arith.constant dense<0.000000e+00> : vector<128x512xf32>
    %9 = tpu.matmul %5, %8, %cst_9 {dimension_numbers = #tpu.dot_dimension_numbers<[1], [0], [0], [1], [0, 0, 1, 1], [], []>} : vector<128x200xbf16>, vector<200x512xbf16>, vector<128x512xf32> -> vector<128x512xf32>
    %10 = arith.addf %7, %9 : vector<128x512xf32>
    %11 = vector.extract_strided_slice %10 {offsets = [0, 0], sizes = [128, 256], strides = [1, 1]} : vector<128x512xf32> to vector<128x256xf32>
    %12 = vector.extract_strided_slice %10 {offsets = [0, 256], sizes = [128, 256], strides = [1, 1]} : vector<128x512xf32> to vector<128x256xf32>
    %13 = arith.mulf %11, %11 : vector<128x256xf32>
    %14 = arith.mulf %12, %12 : vector<128x256xf32>
    %15 = arith.addf %13, %14 : vector<128x256xf32>
    %16 = arith.truncf %15 : vector<128x256xf32> to vector<128x256xbf16>
    %c0_10 = arith.constant 0 : index
    %c0_11 = arith.constant 0 : index
    %17 = vector.load %arg6[%c0_10, %c0_11] : memref<256x128xbf16, #tpu.memory_space<vmem>>, vector<256x128xbf16>
    %cst_12 = arith.constant dense<0.000000e+00> : vector<128x128xf32>
    %18 = tpu.matmul %16, %17, %cst_12 {dimension_numbers = #tpu.dot_dimension_numbers<[1], [0], [0], [1], [0, 0, 1, 1], [], []>} : vector<128x256xbf16>, vector<256x128xbf16>, vector<128x128xf32> -> vector<128x128xf32>
    %cst_13 = arith.constant 1.000000e-10 : f32
    %19 = vector.broadcast %cst_13 : f32 to vector<128x128xf32>
    %20 = arith.maximumf %18, %19 : vector<128x128xf32>
    %21 = math.log %20 : vector<128x128xf32>
    %cst_14 = arith.constant 0.434294492 : f32
    %22 = vector.broadcast %cst_14 : f32 to vector<128x128xf32>
    %23 = arith.mulf %21, %22 : vector<128x128xf32>
    %cst_15 = arith.constant 1.000000e+01 : f32
    %24 = vector.broadcast %cst_15 : f32 to vector<128x128xf32>
    %25 = arith.mulf %24, %23 : vector<128x128xf32>
    %26 = arith.truncf %25 : vector<128x128xf32> to vector<128x128xbf16>
    %c0_16 = arith.constant 0 : index
    %c0_17 = arith.constant 0 : index
    %c0_18 = arith.constant 0 : index
    %27 = vector.load %arg7[%c0_16, %c0_17, %c0_18] : memref<1x128x128xbf16, #tpu.memory_space<vmem>>, vector<1x128x128xbf16>
    %28 = vector.shape_cast %27 : vector<1x128x128xbf16> to vector<128x128xbf16>
    %29 = vector.shape_cast %26 : vector<128x128xbf16> to vector<1x128x128xbf16>
    tpu.vector_store %arg7[%c0_16, %c0_17, %c0_18], %29 {strides = array<i32>} : memref<1x128x128xbf16, #tpu.memory_space<vmem>>, vector<1x128x128xbf16>,
    %c0_i32 = arith.constant 0 : i32
    %30 = arith.cmpi eq, %arg1, %c0_i32 : i32
    %31 = arith.extui %30 : i1 to i32
    %c0_i32_19 = arith.constant 0 : i32
    %32 = arith.cmpi ne, %31, %c0_i32_19 : i32
    scf.if %32 {
      %36 = tpu.iota {dimensions = array<i32: 0>} : vector<128x128xi32>
      %c128_i32 = arith.constant 128 : i32
      %37 = arith.muli %arg1, %c128_i32 : i32
      %38 = vector.broadcast %37 : i32 to vector<128x128xi32>
      %39 = arith.addi %36, %38 : vector<128x128xi32>
      %c6_i32 = arith.constant 6 : i32
      %40 = vector.broadcast %c6_i32 : i32 to vector<128x128xi32>
      %41 = arith.cmpi slt, %39, %40 : vector<128x128xi32>
      %cst_21 = arith.constant -1.000000e+30 : f32
      %42 = vector.broadcast %cst_21 : f32 to vector<128x128xf32>
      %43 = arith.select %41, %25, %42 : vector<128x128xi1>, vector<128x128xf32>
      %cst_22 = arith.constant dense<0xFF800000> : vector<128xf32>
      %44 = vector.multi_reduction <maximumf>, %43, %cst_22 [0] : vector<128x128xf32> to vector<128xf32>
      %45 = vector.shape_cast %44 : vector<128xf32> to vector<1x128xf32>
      %46 = vector.shape_cast %45 : vector<1x128xf32> to vector<1x128xf32>
      %47 = vector.broadcast %46 : vector<1x128xf32> to vector<8x128xf32>
      %c0_23 = arith.constant 0 : index
      %c0_24 = arith.constant 0 : index
      %c0_25 = arith.constant 0 : index
      %c0_26 = arith.constant 0 : index
      %48 = vector.load %arg8[%c0_23, %c0_24, %c0_25, %c0_26] : memref<1x1x8x128xf32, #tpu.memory_space<vmem>>, vector<1x1x8x128xf32>
      %49 = vector.shape_cast %48 : vector<1x1x8x128xf32> to vector<8x128xf32>
      %50 = vector.shape_cast %47 : vector<8x128xf32> to vector<1x1x8x128xf32>
      tpu.vector_store %arg8[%c0_23, %c0_24, %c0_25, %c0_26], %50 {strides = array<i32>} : memref<1x1x8x128xf32, #tpu.memory_space<vmem>>, vector<1x1x8x128xf32>,
    } else {
    }
    %true = arith.constant true
    %33 = arith.xori %30, %true : i1
    %34 = arith.extui %33 : i1 to i32
    %c0_i32_20 = arith.constant 0 : i32
    %35 = arith.cmpi ne, %34, %c0_i32_20 : i32
    scf.if %35 {
      %cst_21 = arith.constant dense<0xFF800000> : vector<128xf32>
      %36 = vector.multi_reduction <maximumf>, %25, %cst_21 [0] : vector<128x128xf32> to vector<128xf32>
      %37 = vector.shape_cast %36 : vector<128xf32> to vector<1x128xf32>
      %38 = vector.shape_cast %37 : vector<1x128xf32> to vector<1x128xf32>
      %39 = vector.broadcast %38 : vector<1x128xf32> to vector<8x128xf32>
      %c0_22 = arith.constant 0 : index
      %c0_23 = arith.constant 0 : index
      %c0_24 = arith.constant 0 : index
      %c0_25 = arith.constant 0 : index
      %40 = vector.load %arg8[%c0_22, %c0_23, %c0_24, %c0_25] : memref<1x1x8x128xf32, #tpu.memory_space<vmem>>, vector<1x1x8x128xf32>
      %41 = vector.shape_cast %40 : vector<1x1x8x128xf32> to vector<8x128xf32>
      %42 = vector.shape_cast %39 : vector<8x128xf32> to vector<1x1x8x128xf32>
      tpu.vector_store %arg8[%c0_22, %c0_23, %c0_24, %c0_25], %42 {strides = array<i32>} : memref<1x1x8x128xf32, #tpu.memory_space<vmem>>, vector<1x1x8x128xf32>,
    } else {
    }
    return
  }
  func.func @transform_0(%arg0: i32, %arg1: i32) -> (i32, i32, i32) {
    %c0_i32 = arith.constant 0 : i32
    %c0_i32_0 = arith.constant 0 : i32
    return %arg0, %arg1, %c0_i32 : i32, i32, i32
  }
  func.func @transform_1(%arg0: i32, %arg1: i32) -> (i32, i32, i32) {
    %c0_i32 = arith.constant 0 : i32
    %c0_i32_0 = arith.constant 0 : i32
    return %arg0, %arg1, %c0_i32 : i32, i32, i32
  }
  func.func @transform_2(%arg0: i32, %arg1: i32) -> (i32, i32) {
    %c0_i32 = arith.constant 0 : i32
    %c0_i32_0 = arith.constant 0 : i32
    %c0_i32_1 = arith.constant 0 : i32
    return %c0_i32, %c0_i32_0 : i32, i32
  }
  func.func @transform_3(%arg0: i32, %arg1: i32) -> (i32, i32) {
    %c0_i32 = arith.constant 0 : i32
    %c0_i32_0 = arith.constant 0 : i32
    %c0_i32_1 = arith.constant 0 : i32
    return %c0_i32, %c0_i32_0 : i32, i32
  }
  func.func @transform_4(%arg0: i32, %arg1: i32) -> (i32, i32) {
    %c0_i32 = arith.constant 0 : i32
    %c0_i32_0 = arith.constant 0 : i32
    %c0_i32_1 = arith.constant 0 : i32
    return %c0_i32, %c0_i32_0 : i32, i32
  }
  func.func @transform_5(%arg0: i32, %arg1: i32) -> (i32, i32, i32) {
    %c0_i32 = arith.constant 0 : i32
    %c0_i32_0 = arith.constant 0 : i32
    return %arg0, %arg1, %c0_i32 : i32, i32, i32
  }
  func.func @transform_6(%arg0: i32, %arg1: i32) -> (i32, i32, i32, i32) {
    %c0_i32 = arith.constant 0 : i32
    %c0_i32_0 = arith.constant 0 : i32
    %c0_i32_1 = arith.constant 0 : i32
    return %arg0, %arg1, %c0_i32, %c0_i32_0 : i32, i32, i32, i32
  }
}

module attributes {stable_mosaic.version = 11 : i64} {
  func.func @_dct_kernel(%arg0: i32, %arg1: i32, %arg2: memref<2xf32, #tpu.memory_space<smem>>, %arg3: memref<1x128x128xbf16, #tpu.memory_space<vmem>>, %arg4: memref<40x128xf32, #tpu.memory_space<vmem>>, %arg5: memref<1x40x128xf32, #tpu.memory_space<vmem>>) attributes {dimension_semantics = [#tpu.dimension_semantics<parallel>, #tpu.dimension_semantics<parallel>], iteration_bounds = array<i64: 2, 1>, scalar_prefetch = 0 : i64, scratch_operands = 0 : i64, tpu.core_type = #tpu.core_type<tc>, window_params = [{transform_indices = @transform_0, window_bounds = array<i64: 2>}, {transform_indices = @transform_1, window_bounds = array<i64: 1, 128, 128>}, {pipeline_mode = #tpu.pipeline_mode<synchronous>, transform_indices = @transform_2, window_bounds = array<i64: 40, 128>}, {transform_indices = @transform_3, window_bounds = array<i64: 1, 40, 128>}]} {
    %0 = arith.index_cast %arg0 : i32 to index
    %1 = memref.load %arg2[%0] : memref<2xf32, #tpu.memory_space<smem>>
    %cst = arith.constant 8.000000e+01 : f32
    %2 = arith.subf %1, %cst : f32
    %c0 = arith.constant 0 : index
    %c0_0 = arith.constant 0 : index
    %c0_1 = arith.constant 0 : index
    %3 = vector.load %arg3[%c0, %c0_0, %c0_1] : memref<1x128x128xbf16, #tpu.memory_space<vmem>>, vector<1x128x128xbf16>
    %4 = vector.shape_cast %3 : vector<1x128x128xbf16> to vector<128x128xbf16>
    %5 = arith.extf %4 : vector<128x128xbf16> to vector<128x128xf32>
    %6 = vector.broadcast %2 : f32 to vector<128x128xf32>
    %7 = arith.maximumf %5, %6 : vector<128x128xf32>
    %c0_2 = arith.constant 0 : index
    %c0_3 = arith.constant 0 : index
    %8 = vector.load %arg4[%c0_2, %c0_3] : memref<40x128xf32, #tpu.memory_space<vmem>>, vector<40x128xf32>
    %cst_4 = arith.constant dense<0.000000e+00> : vector<40x128xf32>
    %9 = tpu.matmul %8, %7, %cst_4 {dimension_numbers = #tpu.dot_dimension_numbers<[1], [1], [0], [0], [0, 0, 1, 0], [], []>} : vector<40x128xf32>, vector<128x128xf32>, vector<40x128xf32> -> vector<40x128xf32>
    %c0_5 = arith.constant 0 : index
    %c0_6 = arith.constant 0 : index
    %c0_7 = arith.constant 0 : index
    %10 = vector.load %arg5[%c0_5, %c0_6, %c0_7] : memref<1x40x128xf32, #tpu.memory_space<vmem>>, vector<1x40x128xf32>
    %11 = vector.shape_cast %10 : vector<1x40x128xf32> to vector<40x128xf32>
    %12 = vector.shape_cast %9 : vector<40x128xf32> to vector<1x40x128xf32>
    tpu.vector_store %arg5[%c0_5, %c0_6, %c0_7], %12 {strides = array<i32>} : memref<1x40x128xf32, #tpu.memory_space<vmem>>, vector<1x40x128xf32>,
    return
  }
  func.func @transform_0(%arg0: i32, %arg1: i32) -> i32 {
    %c0_i32 = arith.constant 0 : i32
    %c0_i32_0 = arith.constant 0 : i32
    return %c0_i32 : i32
  }
  func.func @transform_1(%arg0: i32, %arg1: i32) -> (i32, i32, i32) {
    %c0_i32 = arith.constant 0 : i32
    %c0_i32_0 = arith.constant 0 : i32
    return %arg0, %arg1, %c0_i32 : i32, i32, i32
  }
  func.func @transform_2(%arg0: i32, %arg1: i32) -> (i32, i32) {
    %c0_i32 = arith.constant 0 : i32
    %c0_i32_0 = arith.constant 0 : i32
    %c0_i32_1 = arith.constant 0 : i32
    return %c0_i32, %c0_i32_0 : i32, i32
  }
  func.func @transform_3(%arg0: i32, %arg1: i32) -> (i32, i32, i32) {
    %c0_i32 = arith.constant 0 : i32
    %c0_i32_0 = arith.constant 0 : i32
    return %arg0, %c0_i32, %arg1 : i32, i32, i32
  }
}

</mosaic_0001>

<bundles_post_ra>
// kernel: reverse.1
= control target key start
LH: loop header
LB: loop body
LE: loop exit
PB: predicated region body
PF: predicated region fallthrough
CT: control target
= control target key end

     0   :  { %v2_v0 = vlaneseq  ;;  %s318_s0 = inlined_call_operand.vmem [shape: f32[2,256], index: 0, kind: input, shape index: {}]   ;;  %s319_s1 = inlined_call_operand.vmem [shape: f32[2,256], index: 1, kind: output, shape index: {}]  }
   0x2   :  { %v3_v1 = vsub.s32 127, %v2_v0 }
   0x4   :  { %4 = vset.pattern.permute.xlu0 %v3_v1 }
   0x5   :  { %s278_s6 = smov 0   ;;  %s280_s7 = smov 0  }
   0x6   :  { %s282_s8 = smov 0  }
   0x7 LB: > { %s208_s9 = sadd.s32 4294967295, %s266_s8   ;;  %s19_s10 = sadd.s32 1, %s262_s7  ;;  %s266_s8 = sphi %s282_s8, %s10_s8   ;;  %s262_s7 = sphi %s280_s7, %s321_s7   ;;  %s258_s6 = sphi %s278_s6, %s320_s6  }
   0x8   : > { %p20_p0 = scmp.ge.s32.totalorder %s19_s10, 2  ;;  %p210_p1 = scmp.ge.s32.totalorder %s266_s8, 2 }
   0x9   : > { %s38_s11 = sand.u32 (!%p210_p1), 1, %s266_s8   ;;  %s41_s12 = ssub.s32 (!%p210_p1), 1, %s262_s7 }
   0xa   : > { %s323_s10 = smov (%p20_p0, %s19_s10), 0  ;;  %36 = sbr.rel (%p210_p1) target bundleno = 17 (0x11), region = 16 }
   0xb   : > { %s211_s13 = sshll.u32 (!%p210_p1), %s38_s11, 1  ;;  %s212_s14 = sshll.u32 (!%p210_p1), %s41_s12, 1 }
   0xc   : > { %s45_s17 = scalar_lea.vmem (!%p210_p1), %s318_s0, %s212_s14  ;;  %s40_s18 = scalar_lea.vmem (!%p210_p1), [#allocation1], %s211_s13 }
   0xf   : > { %v62_v2 = vld [vmem:[%s45_s17] sm:$0x3] }
  0x10   : > { %63 = vst [vmem:[%s40_s18] sm:$0x3] %v62_v2 }
  0x11 PF: > { %p213_p2 = scmp.ge.s32.totalorder %s266_s8, 1  ;;  %p80_p3 = scmp.lt.s32.totalorder %s266_s8, 3 }
  0x13   : > { %p81_p4 = pnand %p213_p2, %p80_p3 }
  0x14   : > { %s91_s19 = sand.u32 (!%p81_p4), 1, %s208_s9   ;;  %s217_s23 = sshll.u32 (!%p81_p4), %s258_s6, 1 }
  0x15   : > { %84 = sbr.rel (%p81_p4) target bundleno = 176 (0xb0), region = 50  ;;  %s214_s20 = sshll.u32 (!%p81_p4), %s91_s19, 1 }
  0x16   : > { %s93_s21 = scalar_lea.vmem (!%p81_p4), [#allocation1], %s214_s20  ;;  %s97_s22 = scalar_lea.vmem (!%p81_p4), [#allocation3], %s214_s20 }
  0x17   : > { %s123_s26 = scalar_lea.vmem (!%p81_p4), %s319_s1, %s217_s23 }
  0x1a   : > { %v101_v3 = vld [vmem:[%s93_s21] sm:$0x3] }
  0x1b   : > { %102 = vst [vmem:[#allocation0] sm:$0x3] %v101_v3 }
  0x22   : > { %v104_v4 = vld [vmem:[#allocation0] sm:$0xff] }
  0x23   : > { %105 = vperm.xlu0 %4, %v104_v4  }
  0x9e   : > { %v106_v5 = vpop.permute.xlu0 %105 }
  0x9f   : > { %107 = vst [vmem:[#allocation2] sm:$0xff] %v106_v5 }
  0xa6   : > { %v112_v6 = vld [vmem:[#allocation2] sm:$0x3] }
  0xa7   : > { %115 = vst [vmem:[%s97_s22] sm:$0x3] %v112_v6 }
  0xae   : > { %v140_v7 = vld [vmem:[%s97_s22] sm:$0x3] }
  0xaf   : > { %141 = vst [vmem:[%s123_s26] sm:$0x3] %v140_v7 }
  0xb0 PF: > { %s10_s8 = sadd.s32 1, %s266_s8   ;;  %s320_s6 = smov %s262_s7 }
  0xb1   : > { %p7_p5 = scmp.ge.s32.totalorder %s10_s8, 4   ;;  %s321_s7 = smov %s323_s10 }
  0xb3   :  { %9 = sbr.rel (!%p7_p5) target bundleno = 7 (0x7), region = 110 }

// kernel: mfcc_forward.3
= control target key start
LH: loop header
LB: loop body
LE: loop exit
PB: predicated region body
PF: predicated region fallthrough
CT: control target
= control target key end

     0   :  { %8 = vsyncpa [#allocation3], 0  ;;  %s725_s12 = smov 0   ;;  %s727_s13 = smov 0   ;;  %s874_s0 = inlined_call_operand.vmem [shape: f32[2], index: 0, kind: input, shape index: {}]   ;;  %s875_s1 = inlined_call_operand.vmem [shape: bf16[2,128,128], index: 1, kind: input, shape index: {}]   ;;  %s876_s2 = inlined_call_operand.vmem [shape: f32[40,128], index: 2, kind: input, shape index: {}]   ;;  %s877_s3 = inlined_call_operand.vmem [shape: f32[2,40,128], index: 3, kind: output, shape index: {}]  }
   0x1   :  { %s729_s14 = smov 0  }
   0x2 LB: > { %s468_s15 = sadd.s32 4294967295, %s700_s14   ;;  %s26_s16 = sadd.s32 1, %s696_s13  ;;  %s700_s14 = sphi %s729_s14, %s14_s14   ;;  %s696_s13 = sphi %s727_s13, %s881_s13   ;;  %s692_s12 = sphi %s725_s12, %s880_s12  }
   0x3   : > { %p28_p0 = scmp.ge.s32.totalorder %s26_s16, 2  ;;  %p470_p1 = scmp.ge.s32.totalorder %s700_s14, 1 }
   0x4   : > { %p129_p2 = scmp.lt.s32.totalorder %s700_s14, 3  ;;  %p750_p4 = scmp.eq.s32.totalorder %s468_s15, 0 }
   0x5   : > { %s883_s16 = smov (%p28_p0, %s26_s16), 0  ;;  %s142_s21 = sshll.u32 %s874_s0, 4  ;;  %s143_s21 = int_to_ptr.vmem [resolvable:$true] %s142_s21 }
   0x6   : > { %p746_p3 = pnand %p470_p1, %p129_p2  ;;  %s659_s22 = scalar_lea.vmem %s143_s21, 16 }
   0x7   : > { %p660_p7 = scmp.ne.s32.totalorder %s143_s21, %s659_s22  ;;  %p667_p11 = scmp.lt.s32.totalorder %s143_s21, %s143_s21 }
   0x8   : > { %p626_p5 = pneg %p746_p3  ;;  %p668_p12 = scmp.lt.s32.totalorder %s659_s22, %s659_s22 }
   0xa   : > { %p627_p6 = pnand %p750_p4, %p626_p5  ;;  %p669_p13 = por %p668_p12, %p667_p11 }
   0xc   : > { %p661_p8 = pneg %p627_p6 }
   0xe   : > { %p662_p9 = pnand %p661_p8, %p660_p7 }
  0x10   : > { %p663_p10 = pneg %p662_p9 }
  0x12   : > { %p670_p0 = pnand %p669_p13, %p663_p10 }
  0x14   : > { %673 = shalt.err (!%p670_p0)
}
  0x15   : > { %s702_s23 = smov [#allocation2]   ;;  %171 = sbr.rel (%p746_p3) target bundleno = 306 (0x132), region = 32 }
  0x16   : > { %629 = dma.vmem_to_smem (!%p627_p6), %s143_s21, 16, %s702_s23, [#allocation3]  }
  0x1a   : > { %687 = dma.done.wait (%p750_p4), [#allocation3], 16  }
  0x1b   : > { %689 = vsyncadd (%p750_p4), [#allocation3], 4294967280 }
  0x1c   : > { %177 = sfence }
  0x1d   : > { %p204_p1 = scmp.lt.s32.totalorder %s692_s12, 1  ;;  %s221_s24 = sld [smem:[#allocation2 + %s692_s12]]  ;;  %v703_v0 = vmov 0.0   ;;  %vm704_vm0 = vmmov 0   ;;  %v272_v42 = vld [vmem:[%s876_s2] sm:$0xff]  ;;  %v275_v43 = vld [vmem:[%s876_s2 + $0x18] sm:$0xff] }
  0x1e   : > { %542 = vmatprep.subr.mxu0 %v703_v0  ;;  %589 = vmatprep.subr.mxu1 %v703_v0  ;;  %v273_v44 = vld [vmem:[%s876_s2 + $0x8] sm:$0xff]  ;;  %v276_v45 = vld [vmem:[%s876_s2 + $0x20] sm:$0xff]  ;;  %v274_v46 = vld [vmem:[%s876_s2 + $0x10] sm:$0xff] }
  0x1f   : > { %s885_s12 = smov (!%p204_p1, %s692_s12), 1  ;;  %574 = vmatprep.mubr.msk.f32.mxu0 %vm704_vm0, %v703_v0  ;;  %583 = vmatprep.mubr.msk.f32.mxu1 %vm704_vm0, %v703_v0 }
  0x20   : > { %s481_s25 = sshll.u32 %s885_s12, 6  ;;  %s621_s17 = smul.u32 40, %s885_s12 }
  0x21   : > { %s782_s28 = scalar_lea.vmem %s875_s1, %s481_s25 }
  0x22   : > { %v520_v1 = vld [vmem:[%s782_s28 + $0x38] sm:$0xff]   ;;  %v519_v5 = vld [vmem:[%s782_s28 + $0x30] sm:$0xff]   ;;  %v518_v11 = vld [vmem:[%s782_s28 + $0x28] sm:$0xff]   ;;  %s220_s20 = scalar_lea.vmem %s877_s3, %s621_s17 }
  0x23   : > { %s478_s29 = sadd.f32 -80.0, %s221_s24  ;;  %v512_v2 = vunpack.c.l.bf16 %v520_v1  ;;  %v513_v3 = vunpack.c.h.bf16 %v520_v1  ;;  %v509_v8 = vunpack.c.h.bf16 %v519_v5  ;;  %v508_v10 = vunpack.c.l.bf16 %v519_v5  ;;  %v517_v16 = vld [vmem:[%s782_s28 + $0x20] sm:$0xff]   ;;  %v516_v21 = vld [vmem:[%s782_s28 + $0x18] sm:$0xff]   ;;  %v515_v26 = vld [vmem:[%s782_s28 + $0x10] sm:$0xff]  }
  0x24   : > { %v505_v13 = vunpack.c.h.bf16 %v518_v11  ;;  %v504_v15 = vunpack.c.l.bf16 %v518_v11  ;;  %v501_v18 = vunpack.c.h.bf16 %v517_v16  ;;  %v500_v20 = vunpack.c.l.bf16 %v517_v16  ;;  %v514_v31 = vld [vmem:[%s782_s28 + $0x8] sm:$0xff]   ;;  %v483_v36 = vld [vmem:[%s782_s28] sm:$0xff]  }
  0x25   : > { %v785_v4 = vstv %s478_s29  ;;  %v497_v23 = vunpack.c.h.bf16 %v516_v21  ;;  %v496_v25 = vunpack.c.l.bf16 %v516_v21  ;;  %v493_v28 = vunpack.c.h.bf16 %v515_v26 }
  0x26   : > { %v271_v6 = vmax.f32 %v513_v3, %v785_v4  ;;  %v270_v7 = vmax.f32 %v512_v2, %v785_v4  ;;  %v269_v9 = vmax.f32 %v509_v8, %v785_v4  ;;  %v268_v12 = vmax.f32 %v508_v10, %v785_v4 }
  0x27   : > { %v267_v14 = vmax.f32 %v505_v13, %v785_v4  ;;  %v266_v17 = vmax.f32 %v504_v15, %v785_v4  ;;  %v265_v19 = vmax.f32 %v501_v18, %v785_v4  ;;  %v264_v22 = vmax.f32 %v500_v20, %v785_v4 }
  0x28   : > { %543 = vmatpush3.xpose.msra.mxu0 %v271_v6  ;;  %605 = vmatpush3.xpose.msra.mxu1 %v271_v6  ;;  %v263_v24 = vmax.f32 %v497_v23, %v785_v4  ;;  %v262_v27 = vmax.f32 %v496_v25, %v785_v4  ;;  %v261_v29 = vmax.f32 %v493_v28, %v785_v4  ;;  %v492_v30 = vunpack.c.l.bf16 %v515_v26 }
  0x29   : > { %544 = vmatprep.subr.mxu0 %v703_v0  ;;  %590 = vmatprep.subr.mxu1 %v703_v0  ;;  %v489_v33 = vunpack.c.h.bf16 %v514_v31  ;;  %v488_v35 = vunpack.c.l.bf16 %v514_v31  ;;  %v485_v38 = vunpack.c.h.bf16 %v483_v36  ;;  %v484_v40 = vunpack.c.l.bf16 %v483_v36 }
  0x2a   : > { %v260_v32 = vmax.f32 %v492_v30, %v785_v4 }
  0x2b   : > { %v259_v34 = vmax.f32 %v489_v33, %v785_v4  ;;  %v258_v37 = vmax.f32 %v488_v35, %v785_v4  ;;  %v257_v39 = vmax.f32 %v485_v38, %v785_v4  ;;  %v256_v41 = vmax.f32 %v484_v40, %v785_v4 }
  0x2c   : > { %545 = vmatpush3.xpose.msra.mxu0 %v270_v7  ;;  %606 = vmatpush3.xpose.msra.mxu1 %v270_v7 }
  0x2d   : > { %546 = vmatprep.subr.mxu0 %v703_v0  ;;  %591 = vmatprep.subr.mxu1 %v703_v0 }
  0x30   : > { %547 = vmatpush3.xpose.msra.mxu0 %v269_v9  ;;  %607 = vmatpush3.xpose.msra.mxu1 %v269_v9 }
  0x31   : > { %548 = vmatprep.subr.mxu0 %v703_v0  ;;  %592 = vmatprep.subr.mxu1 %v703_v0 }
  0x34   : > { %549 = vmatpush3.xpose.msra.mxu0 %v268_v12  ;;  %608 = vmatpush3.xpose.msra.mxu1 %v268_v12 }
  0x35   : > { %550 = vmatprep.subr.mxu0 %v703_v0  ;;  %593 = vmatprep.subr.mxu1 %v703_v0 }
  0x38   : > { %551 = vmatpush3.xpose.msra.mxu0 %v267_v14  ;;  %609 = vmatpush3.xpose.msra.mxu1 %v267_v14 }
  0x39   : > { %552 = vmatprep.subr.mxu0 %v703_v0  ;;  %594 = vmatprep.subr.mxu1 %v703_v0 }
  0x3c   : > { %553 = vmatpush3.xpose.msra.mxu0 %v266_v17  ;;  %610 = vmatpush3.xpose.msra.mxu1 %v266_v17 }
  0x3d   : > { %554 = vmatprep.subr.mxu0 %v703_v0  ;;  %595 = vmatprep.subr.mxu1 %v703_v0 }
  0x40   : > { %555 = vmatpush3.xpose.msra.mxu0 %v265_v19  ;;  %611 = vmatpush3.xpose.msra.mxu1 %v265_v19 }
  0x41   : > { %556 = vmatprep.subr.mxu0 %v703_v0  ;;  %596 = vmatprep.subr.mxu1 %v703_v0 }
  0x44   : > { %557 = vmatpush3.xpose.msra.mxu0 %v264_v22  ;;  %612 = vmatpush3.xpose.msra.mxu1 %v264_v22 }
  0x45   : > { %558 = vmatprep.subr.mxu0 %v703_v0  ;;  %597 = vmatprep.subr.mxu1 %v703_v0 }
  0x48   : > { %559 = vmatpush3.xpose.msra.mxu0 %v263_v24  ;;  %613 = vmatpush3.xpose.msra.mxu1 %v263_v24 }
  0x49   : > { %560 = vmatprep.subr.mxu0 %v703_v0  ;;  %598 = vmatprep.subr.mxu1 %v703_v0 }
  0x4c   : > { %561 = vmatpush3.xpose.msra.mxu0 %v262_v27  ;;  %614 = vmatpush3.xpose.msra.mxu1 %v262_v27 }
  0x4d   : > { %562 = vmatprep.subr.mxu0 %v703_v0  ;;  %599 = vmatprep.subr.mxu1 %v703_v0 }
  0x50   : > { %563 = vmatpush3.xpose.msra.mxu0 %v261_v29  ;;  %615 = vmatpush3.xpose.msra.mxu1 %v261_v29 }
  0x51   : > { %564 = vmatprep.subr.mxu0 %v703_v0  ;;  %600 = vmatprep.subr.mxu1 %v703_v0 }
  0x54   : > { %565 = vmatpush3.xpose.msra.mxu0 %v260_v32  ;;  %616 = vmatpush3.xpose.msra.mxu1 %v260_v32 }
  0x55   : > { %566 = vmatprep.subr.mxu0 %v703_v0  ;;  %601 = vmatprep.subr.mxu1 %v703_v0 }
  0x58   : > { %567 = vmatpush3.xpose.msra.mxu0 %v259_v34  ;;  %617 = vmatpush3.xpose.msra.mxu1 %v259_v34 }
  0x59   : > { %568 = vmatprep.subr.mxu0 %v703_v0  ;;  %602 = vmatprep.subr.mxu1 %v703_v0 }
  0x5c   : > { %569 = vmatpush3.xpose.msra.mxu0 %v258_v37  ;;  %618 = vmatpush3.xpose.msra.mxu1 %v258_v37 }
  0x5d   : > { %570 = vmatprep.subr.mxu0 %v703_v0  ;;  %603 = vmatprep.subr.mxu1 %v703_v0 }
  0x60   : > { %571 = vmatpush3.xpose.msra.mxu0 %v257_v39  ;;  %619 = vmatpush3.xpose.msra.mxu1 %v257_v39 }
  0x61   : > { %572 = vmatprep.subr.mxu0 %v703_v0  ;;  %604 = vmatprep.subr.mxu1 %v703_v0 }
  0x64   : > { %573 = vmatpush3.xpose.msra.mxu0 %v256_v41  ;;  %620 = vmatpush3.xpose.msra.mxu1 %v256_v41 }
  0x67   : > { %575 = vmatmul.mubr.f32.vlgmr.msra.gmra.mxu0 %v272_v42  ;;  %584 = vmatmul.mubr.f32.vlgmr.msra.gmra.mxu1 %v275_v43 }
  0x68   : > { %577 = vmatprep.mubr.msk.f32.mxu0 %vm704_vm0, %v703_v0  ;;  %586 = vmatprep.mubr.msk.f32.mxu1 %vm704_vm0, %v703_v0 }
  0x6b   : > { %578 = vmatmul.mubr.f32.gmra.mxu0 %v273_v44  ;;  %587 = vmatmul.mubr.f32.gmra.mxu1 %v276_v45 }
  0x6c   : > { %580 = vmatprep.mubr.msk.f32.mxu0 %vm704_vm0, %v703_v0 }
  0x6f   : > { %581 = vmatmul.mubr.f32.gmra.mxu0 %v274_v46 }
 0x127   : > { %v343_v47 = vpop.f32.mrf.mxu0  ;;  %v358_v48 = vpop.f32.mrf.mxu1 }
 0x128   : > { %367 = vst [vmem:[%s220_s20] sm:$0xff] %v343_v47  ;;  %370 = vst [vmem:[%s220_s20 + $0x18] sm:$0xff] %v358_v48 }
 0x129   : > { %v576_v49 = vpop.f32.mrf.mxu0  ;;  %v585_v50 = vpop.f32.mrf.mxu1 }
 0x12b   : > { %v348_v51 = vpop.f32.mrf.mxu0  ;;  %v363_v52 = vpop.f32.mrf.mxu1 }
 0x12c   : > { %368 = vst [vmem:[%s220_s20 + $0x8] sm:$0xff] %v348_v51  ;;  %371 = vst [vmem:[%s220_s20 + $0x20] sm:$0xff] %v363_v52 }
 0x12d   : > { %v579_v53 = vpop.f32.mrf.mxu0  ;;  %v588_v54 = vpop.f32.mrf.mxu1 }
 0x12f   : > { %v353_v55 = vpop.f32.mrf.mxu0 }
 0x130   : > { %369 = vst [vmem:[%s220_s20 + $0x10] sm:$0xff] %v353_v55 }
 0x131   : > { %v582_v56 = vpop.f32.mrf.mxu0 }
 0x132 PF: > { %s14_s14 = sadd.s32 1, %s700_s14   ;;  %s880_s12 = smov %s696_s13 }
 0x133   : > { %p11_p2 = scmp.ge.s32.totalorder %s14_s14, 4   ;;  %s881_s13 = smov %s883_s16 }
 0x135   :  { %13 = sbr.rel (!%p11_p2) target bundleno = 2 (0x2), region = 67 }
 0x13a   :  { %399 = vsyncpa [#allocation3], 1 }
 0x13b   :  { %401 = vsyncpa [#allocation3 + $0x1], 1 }

// kernel: mfcc_forward.2
= control target key start
LH: loop header
LB: loop body
LE: loop exit
PB: predicated region body
PF: predicated region fallthrough
CT: control target
= control target key end

     0   :  { %s2958_s21 = smov 0   ;;  %s2960_s22 = smov 0   ;;  %s3668_s0 = inlined_call_operand.vmem [shape: f32[2,128,200], index: 0, kind: input, shape index: {}]   ;;  %s3669_s1 = inlined_call_operand.vmem [shape: f32[2,128,200], index: 1, kind: input, shape index: {}]   ;;  %s3670_s2 = inlined_call_operand.vmem [shape: bf16[200,512], index: 2, kind: input, shape index: {}]   ;;  %s3671_s3 = inlined_call_operand.vmem [shape: bf16[200,512], index: 3, kind: input, shape index: {}]   ;;  %s3672_s4 = inlined_call_operand.vmem [shape: bf16[256,128], index: 4, kind: input, shape index: {}]   ;;  %s3673_s5 = inlined_call_operand.vmem [shape: bf16[2,128,128], index: 5, kind: output, shape index: {0}]   ;;  %s3674_s6 = inlined_call_operand.vmem [shape: f32[2,1,8,128], index: 6, kind: output, shape index: {1}]  }
   0x1   :  { %s2962_s23 = smov 0  }
   0x2 LB: > { %s29_s24 = sadd.s32 1, %s2917_s22  ;;  %p2347_p0 = scmp.ge.s32.totalorder %s2921_s23, 1  ;;  %s2921_s23 = sphi %s2962_s23, %s17_s23   ;;  %s2917_s22 = sphi %s2960_s22, %s3712_s22   ;;  %s2913_s21 = sphi %s2958_s21, %s3711_s21  }
   0x3   : > { %p31_p1 = scmp.ge.s32.totalorder %s29_s24, 2  ;;  %p257_p2 = scmp.lt.s32.totalorder %s2921_s23, 3 }
   0x5   : > { %s3714_s24 = smov (%p31_p1, %s29_s24), 0  ;;  %p258_p3 = pnand %p2347_p0, %p257_p2 }
   0x7   : > { %261 = sbr.rel (%p258_p3) target bundleno = 620 (0x26c), region = 40 }
   0xc   : > { %v2699_v0 = vld [vmem:[%s3671_s3 + $0xe4] ss:$16 sps:$4 sm:$0xff]   ;;  %v2701_v1 = vld [vmem:[%s3671_s3 + $0xec] ss:$16 sps:$4 sm:$0xff]   ;;  %v2703_v2 = vld [vmem:[%s3671_s3 + $0xe0] ss:$16 sps:$4 sm:$0xff]  }
   0xd   : > { %837 = vmatprep.subr.bf16.mxu0 %v2699_v0  ;;  %v2704_v3 = vld [vmem:[%s3671_s3 + $0xe8] ss:$16 sps:$4 sm:$0xff]   ;;  %950 = vmatprep.subr.bf16.mxu1 %v2701_v1  ;;  %v2705_v4 = vld [vmem:[%s3671_s3 + $0xc4] ss:$16 sps:$4 sm:$0xff]   ;;  %v2707_v5 = vld [vmem:[%s3671_s3 + $0xcc] ss:$16 sps:$4 sm:$0xff]  }
   0xe   : > { %838 = vmatpush1.bf16.msra.mxu0 %v2703_v2  ;;  %951 = vmatpush1.bf16.msra.mxu1 %v2704_v3  ;;  %v2709_v6 = vld [vmem:[%s3671_s3 + $0xc0] ss:$16 sps:$4 sm:$0xff]   ;;  %v2710_v7 = vld [vmem:[%s3671_s3 + $0xc8] ss:$16 sps:$4 sm:$0xff]   ;;  %v2711_v8 = vld [vmem:[%s3671_s3 + $0xa4] ss:$16 sps:$4 sm:$0xff]  }
   0xf   : > { %839 = vmatprep.subr.bf16.mxu0 %v2705_v4  ;;  %952 = vmatprep.subr.bf16.mxu1 %v2707_v5  ;;  %v2713_v9 = vld [vmem:[%s3671_s3 + $0xac] ss:$16 sps:$4 sm:$0xff]   ;;  %v2715_v10 = vld [vmem:[%s3671_s3 + $0xa0] ss:$16 sps:$4 sm:$0xff]   ;;  %v2716_v11 = vld [vmem:[%s3671_s3 + $0xa8] ss:$16 sps:$4 sm:$0xff]  }
  0x10   : > { %v2717_v12 = vld [vmem:[%s3671_s3 + $0x84] ss:$16 sps:$4 sm:$0xff]   ;;  %v2719_v13 = vld [vmem:[%s3671_s3 + $0x8c] ss:$16 sps:$4 sm:$0xff]   ;;  %v2721_v14 = vld [vmem:[%s3671_s3 + $0x80] ss:$16 sps:$4 sm:$0xff]  }
  0x11   : > { %v2722_v15 = vld [vmem:[%s3671_s3 + $0x88] ss:$16 sps:$4 sm:$0xff]   ;;  %v2723_v16 = vld [vmem:[%s3671_s3 + $0x64] ss:$16 sps:$4 sm:$0xff]   ;;  %v2725_v17 = vld [vmem:[%s3671_s3 + $0x6c] ss:$16 sps:$4 sm:$0xff]  }
  0x12   : > { %840 = vmatpush1.bf16.msra.mxu0 %v2709_v6  ;;  %953 = vmatpush1.bf16.msra.mxu1 %v2710_v7  ;;  %v2727_v18 = vld [vmem:[%s3671_s3 + $0x60] ss:$16 sps:$4 sm:$0xff]   ;;  %v2728_v19 = vld [vmem:[%s3671_s3 + $0x68] ss:$16 sps:$4 sm:$0xff]   ;;  %v2729_v20 = vld [vmem:[%s3671_s3 + $0x44] ss:$16 sps:$4 sm:$0xff]  }
  0x13   : > { %841 = vmatprep.subr.bf16.mxu0 %v2711_v8  ;;  %954 = vmatprep.subr.bf16.mxu1 %v2713_v9  ;;  %v2731_v21 = vld [vmem:[%s3671_s3 + $0x4c] ss:$16 sps:$4 sm:$0xff]   ;;  %p314_p4 = scmp.lt.s32.totalorder %s2913_s21, 1  ;;  %v2733_v22 = vld [vmem:[%s3671_s3 + $0x40] ss:$16 sps:$4 sm:$0xff]   ;;  %vm824_vm0 = vcmask 1043456  }
  0x14   : > { %v2734_v23 = vld [vmem:[%s3671_s3 + $0x48] ss:$16 sps:$4 sm:$0xff]   ;;  %v2735_v24 = vld [vmem:[%s3671_s3 + $0x24] ss:$16 sps:$4 sm:$0xff]   ;;  %v2737_v25 = vld [vmem:[%s3671_s3 + $0x2c] ss:$16 sps:$4 sm:$0xff]  }
  0x15   : > { %v2739_v26 = vld [vmem:[%s3671_s3 + $0x20] ss:$16 sps:$4 sm:$0xff]   ;;  %s3716_s21 = smov (!%p314_p4, %s2913_s21), 1  ;;  %v2740_v27 = vld [vmem:[%s3671_s3 + $0x28] ss:$16 sps:$4 sm:$0xff]   ;;  %vm799_vm1 = vcmask 588800  }
  0x16   : > { %842 = vmatpush1.bf16.msra.mxu0 %v2715_v10  ;;  %955 = vmatpush1.bf16.msra.mxu1 %v2716_v11  ;;  %v2741_v28 = vld [vmem:[%s3671_s3 + $0x4] ss:$16 sps:$4 sm:$0xff]   ;;  %v2743_v29 = vld [vmem:[%s3671_s3 + $0xc] ss:$16 sps:$4 sm:$0xff]   ;;  %v2745_v32 = vld [vmem:[%s3671_s3] ss:$16 sps:$4 sm:$0xff]  }
  0x17   : > { %843 = vmatprep.subr.bf16.mxu0 %v2717_v12  ;;  %956 = vmatprep.subr.bf16.mxu1 %v2719_v13  ;;  %v547_v30 = vld [vmem:[%s3671_s3 + $0x180] sm:$0xff]  ;;  %v548_v31 = vld [vmem:[%s3671_s3 + $0x188] sm:$0xff]  ;;  %s2529_s7 = sshll.u32 %s3716_s21, 8  ;;  %s2531_s14 = sshll.u32 %s3716_s21, 6 }
  0x18   : > { %v2746_v33 = vld [vmem:[%s3671_s3 + $0x8] ss:$16 sps:$4 sm:$0xff]   ;;  %v2404_v34 = vcombine.high %v547_v30, %v547_v30  ;;  %v2406_v35 = vcombine.high %v548_v31, %v548_v31  ;;  %v2403_v36 = vcombine.low %v547_v30, %v547_v30  ;;  %v2405_v37 = vcombine.low %v548_v31, %v548_v31  ;;  %s3090_s12 = scalar_lea.vmem %s3669_s1, %s2529_s7  ;;  %v2751_v38 = vld [vmem:[%s3671_s3 + $0x164] ss:$16 sps:$4 sm:$0xff]   ;;  %v2753_v41 = vld [vmem:[%s3671_s3 + $0x16c] ss:$16 sps:$4 sm:$0xff]   ;;  %s3347_s25 = scalar_lea.vmem %s3668_s0, %s2529_s7 }
  0x19   : > { %v402_v42 = vld [vmem:[%s3090_s12 + $0x8] sm:$0xff]  ;;  %v404_v43 = vld [vmem:[%s3090_s12 + $0x18] sm:$0xff]  ;;  %v2755_v45 = vld [vmem:[%s3671_s3 + $0x160] ss:$16 sps:$4 sm:$0xff]   ;;  %s3645_s17 = scalar_lea.vmem %s3673_s5, %s2531_s14  ;;  %s2354_s18 = sshll.u32 %s3716_s21, 3 }
  0x1a   : > { %844 = vmatpush1.bf16.msra.mxu0 %v2721_v14  ;;  %957 = vmatpush1.bf16.msra.mxu1 %v2722_v15  ;;  %v826_v39 = vsel %vm824_vm0, %v2403_v36, 0  ;;  %v832_v40 = vsel %vm824_vm0, %v2405_v37, 0  ;;  %v434_v44 = vpack.c.bf16 %v404_v43, %v402_v42  ;;  %v2756_v46 = vld [vmem:[%s3671_s3 + $0x168] ss:$16 sps:$4 sm:$0xff]   ;;  %v2757_v47 = vld [vmem:[%s3671_s3 + $0x144] ss:$16 sps:$4 sm:$0xff]  }
  0x1b   : > { %845 = vmatprep.subr.bf16.mxu0 %v2723_v16  ;;  %958 = vmatprep.subr.bf16.mxu1 %v2725_v17  ;;  %v2759_v48 = vld [vmem:[%s3671_s3 + $0x14c] ss:$16 sps:$4 sm:$0xff]   ;;  %v2761_v49 = vld [vmem:[%s3671_s3 + $0x140] ss:$16 sps:$4 sm:$0xff]   ;;  %v2762_v50 = vld [vmem:[%s3671_s3 + $0x148] ss:$16 sps:$4 sm:$0xff]  }
  0x1c   : > { %2408 = vmatprep.mubr.msk.bf16.mxu0 %vm799_vm1, %v434_v44  ;;  %2417 = vmatprep.mubr.msk.bf16.mxu1 %vm799_vm1, %v434_v44  ;;  %v2763_v51 = vld [vmem:[%s3671_s3 + $0x124] ss:$16 sps:$4 sm:$0xff]   ;;  %v2765_v52 = vld [vmem:[%s3671_s3 + $0x12c] ss:$16 sps:$4 sm:$0xff]   ;;  %v2767_v53 = vld [vmem:[%s3671_s3 + $0x120] ss:$16 sps:$4 sm:$0xff]  }
  0x1d   : > { %v2768_v54 = vld [vmem:[%s3671_s3 + $0x128] ss:$16 sps:$4 sm:$0xff]   ;;  %v2769_v55 = vld [vmem:[%s3671_s3 + $0x104] ss:$16 sps:$4 sm:$0xff]   ;;  %v2771_v56 = vld [vmem:[%s3671_s3 + $0x10c] ss:$16 sps:$4 sm:$0xff]  }
  0x1e   : > { %846 = vmatpush1.bf16.msra.mxu0 %v2727_v18  ;;  %959 = vmatpush1.bf16.msra.mxu1 %v2728_v19  ;;  %v2773_v57 = vld [vmem:[%s3671_s3 + $0x100] ss:$16 sps:$4 sm:$0xff]   ;;  %v2774_v58 = vld [vmem:[%s3671_s3 + $0x108] ss:$16 sps:$4 sm:$0xff]   ;;  %v2777_v61 = vld [vmem:[%s3670_s2 + $0xe4] ss:$16 sps:$4 sm:$0xff]  }
  0x1f   : > { %847 = vmatprep.subr.bf16.mxu0 %v2729_v20  ;;  %960 = vmatprep.subr.bf16.mxu1 %v2731_v21  ;;  %v401_v59 = vld [vmem:[%s3090_s12] sm:$0xff]  ;;  %v403_v60 = vld [vmem:[%s3090_s12 + $0x10] sm:$0xff]  ;;  %v2780_v62 = vld [vmem:[%s3670_s2 + $0xec] ss:$16 sps:$4 sm:$0xff]  }
  0x20   : > { %v2775_v63 = vld [vmem:[%s3670_s2 + $0xe0] ss:$16 sps:$4 sm:$0xff]   ;;  %v433_v0 = vpack.c.bf16 %v403_v60, %v401_v59  ;;  %v406_v1 = vld [vmem:[%s3090_s12 + $0x28] sm:$0xff]  ;;  %v408_v2 = vld [vmem:[%s3090_s12 + $0x38] sm:$0xff] }
  0x21   : > { %v2778_v3 = vld [vmem:[%s3670_s2 + $0xe8] ss:$16 sps:$4 sm:$0xff]   ;;  %v2783_v4 = vld [vmem:[%s3670_s2 + $0xc4] ss:$16 sps:$4 sm:$0xff]   ;;  %v2786_v5 = vld [vmem:[%s3670_s2 + $0xcc] ss:$16 sps:$4 sm:$0xff]   ;;  %v436_v6 = vpack.c.bf16 %v408_v2, %v406_v1 }
  0x22   : > { %848 = vmatpush1.bf16.msra.mxu0 %v2733_v22  ;;  %961 = vmatpush1.bf16.msra.mxu1 %v2734_v23  ;;  %v2781_v7 = vld [vmem:[%s3670_s2 + $0xc0] ss:$16 sps:$4 sm:$0xff]   ;;  %v2784_v8 = vld [vmem:[%s3670_s2 + $0xc8] ss:$16 sps:$4 sm:$0xff]   ;;  %v2789_v11 = vld [vmem:[%s3670_s2 + $0xa4] ss:$16 sps:$4 sm:$0xff]  }
  0x23   : > { %849 = vmatprep.subr.bf16.mxu0 %v2735_v24  ;;  %962 = vmatprep.subr.bf16.mxu1 %v2737_v25  ;;  %v405_v9 = vld [vmem:[%s3090_s12 + $0x20] sm:$0xff]  ;;  %v407_v10 = vld [vmem:[%s3090_s12 + $0x30] sm:$0xff]  ;;  %v2792_v12 = vld [vmem:[%s3670_s2 + $0xac] ss:$16 sps:$4 sm:$0xff]  }
  0x24   : > { %v410_v13 = vld [vmem:[%s3090_s12 + $0x48] sm:$0xff]  ;;  %v412_v14 = vld [vmem:[%s3090_s12 + $0x58] sm:$0xff]  ;;  %v435_v15 = vpack.c.bf16 %v407_v10, %v405_v9  ;;  %v2787_v16 = vld [vmem:[%s3670_s2 + $0xa0] ss:$16 sps:$4 sm:$0xff]  }
  0x25   : > { %v2790_v17 = vld [vmem:[%s3670_s2 + $0xa8] ss:$16 sps:$4 sm:$0xff]   ;;  %v438_v18 = vpack.c.bf16 %v412_v14, %v410_v13  ;;  %v2793_v19 = vld [vmem:[%s3670_s2 + $0x80] ss:$16 sps:$4 sm:$0xff]   ;;  %v2795_v20 = vld [vmem:[%s3670_s2 + $0x84] ss:$16 sps:$4 sm:$0xff]  }
  0x26   : > { %850 = vmatpush1.bf16.msra.mxu0 %v2739_v26  ;;  %963 = vmatpush1.bf16.msra.mxu1 %v2740_v27  ;;  %v2796_v21 = vld [vmem:[%s3670_s2 + $0x88] ss:$16 sps:$4 sm:$0xff]   ;;  %v2798_v22 = vld [vmem:[%s3670_s2 + $0x8c] ss:$16 sps:$4 sm:$0xff]   ;;  %v409_v23 = vld [vmem:[%s3090_s12 + $0x40] sm:$0xff] }
  0x27   : > { %851 = vmatprep.subr.bf16.mxu0 %v2741_v28  ;;  %964 = vmatprep.subr.bf16.mxu1 %v2743_v29  ;;  %v411_v24 = vld [vmem:[%s3090_s12 + $0x50] sm:$0xff]  ;;  %v2804_v26 = vld [vmem:[%s3670_s2 + $0x6c] ss:$16 sps:$4 sm:$0xff]   ;;  %v2802_v31 = vld [vmem:[%s3670_s2 + $0x68] ss:$16 sps:$4 sm:$0xff]  }
  0x28   : > { %v2801_v25 = vld [vmem:[%s3670_s2 + $0x64] ss:$16 sps:$4 sm:$0xff]   ;;  %v414_v27 = vld [vmem:[%s3090_s12 + $0x68] sm:$0xff]  ;;  %v416_v28 = vld [vmem:[%s3090_s12 + $0x78] sm:$0xff]  ;;  %v437_v29 = vpack.c.bf16 %v411_v24, %v409_v23 }
  0x29   : > { %v2799_v30 = vld [vmem:[%s3670_s2 + $0x60] ss:$16 sps:$4 sm:$0xff]   ;;  %v2810_v36 = vld [vmem:[%s3670_s2 + $0x4c] ss:$16 sps:$4 sm:$0xff]   ;;  %v2835_v9 = vld [vmem:[%s3670_s2 + $0x144] ss:$16 sps:$4 sm:$0xff]  }
  0x2a   : > { %852 = vmatpush1.bf16.msra.mxu0 %v2745_v32  ;;  %965 = vmatpush1.bf16.msra.mxu1 %v2746_v33  ;;  %v440_v32 = vpack.c.bf16 %v416_v28, %v414_v27  ;;  %v2807_v33 = vld [vmem:[%s3670_s2 + $0x44] ss:$16 sps:$4 sm:$0xff]   ;;  %v2805_v37 = vld [vmem:[%s3670_s2 + $0x40] ss:$16 sps:$4 sm:$0xff]   ;;  %v420_v42 = vld [vmem:[%s3090_s12 + $0x98] sm:$0xff] }
  0x2b   : > { %2407 = vmatprep.subr.msk.bf16.mxu0 %vm824_vm0, %v2404_v34  ;;  %2416 = vmatprep.subr.msk.bf16.mxu1 %vm824_vm0, %v2406_v35  ;;  %v413_v34 = vld [vmem:[%s3090_s12 + $0x60] sm:$0xff]  ;;  %v415_v35 = vld [vmem:[%s3090_s12 + $0x70] sm:$0xff]  ;;  %v2838_v10 = vld [vmem:[%s3670_s2 + $0x14c] ss:$16 sps:$4 sm:$0xff]  }
  0x2c   : > { %v439_v43 = vpack.c.bf16 %v415_v35, %v413_v34  ;;  %v2836_v13 = vld [vmem:[%s3670_s2 + $0x148] ss:$16 sps:$4 sm:$0xff]   ;;  %v2847_v23 = vld [vmem:[%s3670_s2 + $0x104] ss:$16 sps:$4 sm:$0xff]   ;;  %v2850_v24 = vld [vmem:[%s3670_s2 + $0x10c] ss:$16 sps:$4 sm:$0xff]  }
  0x2d   : > { %v2845_v27 = vld [vmem:[%s3670_s2 + $0x100] ss:$16 sps:$4 sm:$0xff]   ;;  %v2848_v28 = vld [vmem:[%s3670_s2 + $0x108] ss:$16 sps:$4 sm:$0xff]  }
  0x2e   : > { %860 = vmatpush2.bf16.msra.mxu0 %v826_v39  ;;  %973 = vmatpush2.bf16.msra.mxu1 %v832_v40  ;;  %v2813_v39 = vld [vmem:[%s3670_s2 + $0x24] ss:$16 sps:$4 sm:$0xff]   ;;  %v2816_v40 = vld [vmem:[%s3670_s2 + $0x2c] ss:$16 sps:$4 sm:$0xff]  }
  0x2f   : > { %861 = vmatprep.subr.bf16.mxu0 %v2751_v38  ;;  %974 = vmatprep.subr.bf16.mxu1 %v2753_v41  ;;  %v2808_v38 = vld [vmem:[%s3670_s2 + $0x48] ss:$16 sps:$4 sm:$0xff]   ;;  %v353_v35 = vld [vmem:[%s3347_s25] sm:$0xff] }
  0x30   : > { %v418_v41 = vld [vmem:[%s3090_s12 + $0x88] sm:$0xff] }
  0x31   : > { %v442_v44 = vpack.c.bf16 %v420_v42, %v418_v41  ;;  %v357_v41 = vld [vmem:[%s3347_s25 + $0x20] sm:$0xff]  ;;  %v359_v42 = vld [vmem:[%s3347_s25 + $0x30] sm:$0xff] }
  0x32   : > { %862 = vmatpush2.bf16.msra.mxu0 %v2755_v45  ;;  %975 = vmatpush2.bf16.msra.mxu1 %v2756_v46  ;;  %v2811_v45 = vld [vmem:[%s3670_s2 + $0x20] ss:$16 sps:$4 sm:$0xff]   ;;  %v2814_v46 = vld [vmem:[%s3670_s2 + $0x28] ss:$16 sps:$4 sm:$0xff]  }
  0x33   : > { %863 = vmatprep.subr.bf16.mxu0 %v2757_v47  ;;  %976 = vmatprep.subr.bf16.mxu1 %v2759_v48  ;;  %v2819_v47 = vld [vmem:[%s3670_s2 + $0x4] ss:$16 sps:$4 sm:$0xff]   ;;  %v2822_v48 = vld [vmem:[%s3670_s2 + $0xc] ss:$16 sps:$4 sm:$0xff]  }
  0x36   : > { %864 = vmatpush2.bf16.msra.mxu0 %v2761_v49  ;;  %977 = vmatpush2.bf16.msra.mxu1 %v2762_v50  ;;  %v497_v49 = vld [vmem:[%s3670_s2 + $0x180] sm:$0xff]  ;;  %v498_v50 = vld [vmem:[%s3670_s2 + $0x188] sm:$0xff] }
  0x37   : > { %865 = vmatprep.subr.bf16.mxu0 %v2763_v51  ;;  %978 = vmatprep.subr.bf16.mxu1 %v2765_v52  ;;  %v417_v51 = vld [vmem:[%s3090_s12 + $0x80] sm:$0xff]  ;;  %v419_v52 = vld [vmem:[%s3090_s12 + $0x90] sm:$0xff]  ;;  %v2473_v59 = vcombine.low %v497_v49, %v497_v49  ;;  %v2475_v60 = vcombine.low %v498_v50, %v498_v50 }
  0x39   : > { %v1338_v1 = vsel %vm824_vm0, %v2473_v59, 0  ;;  %v1344_v2 = vsel %vm824_vm0, %v2475_v60, 0  ;;  %v369_v59 = vld [vmem:[%s3347_s25 + $0x80] sm:$0xff]  ;;  %v371_v60 = vld [vmem:[%s3347_s25 + $0x90] sm:$0xff] }
  0x3a   : > { %866 = vmatpush2.bf16.msra.mxu0 %v2767_v53  ;;  %979 = vmatpush2.bf16.msra.mxu1 %v2768_v54  ;;  %v2817_v53 = vld [vmem:[%s3670_s2] ss:$16 sps:$4 sm:$0xff]   ;;  %v2820_v54 = vld [vmem:[%s3670_s2 + $0x8] ss:$16 sps:$4 sm:$0xff]  }
  0x3b   : > { %867 = vmatprep.subr.bf16.mxu0 %v2769_v55  ;;  %980 = vmatprep.subr.bf16.mxu1 %v2771_v56  ;;  %v422_v55 = vld [vmem:[%s3090_s12 + $0xa8] sm:$0xff]  ;;  %v424_v56 = vld [vmem:[%s3090_s12 + $0xb8] sm:$0xff] }
  0x3e   : > { %868 = vmatpush2.bf16.msra.mxu0 %v2773_v57  ;;  %981 = vmatpush2.bf16.msra.mxu1 %v2774_v58  ;;  %v2474_v57 = vcombine.high %v497_v49, %v497_v49  ;;  %v2476_v58 = vcombine.high %v498_v50, %v498_v50  ;;  %v366_v49 = vld [vmem:[%s3347_s25 + $0x68] sm:$0xff]  ;;  %v368_v50 = vld [vmem:[%s3347_s25 + $0x78] sm:$0xff] }
  0x3f   : > { %1349 = vmatprep.subr.bf16.mxu0 %v2777_v61  ;;  %1462 = vmatprep.subr.bf16.mxu1 %v2780_v62  ;;  %v441_v61 = vpack.c.bf16 %v419_v52, %v417_v51  ;;  %v444_v62 = vpack.c.bf16 %v424_v56, %v422_v55  ;;  %v392_v52 = vpack.c.bf16 %v368_v50, %v366_v49  ;;  %v370_v55 = vld [vmem:[%s3347_s25 + $0x88] sm:$0xff]  ;;  %v372_v56 = vld [vmem:[%s3347_s25 + $0x98] sm:$0xff] }
  0x41   : > { %870 = vmatmul.mubr.bf16.vlgmr.msra.gmra.mxu0 %v433_v0  ;;  %983 = vmatmul.mubr.bf16.vlgmr.msra.gmra.mxu1 %v433_v0  ;;  %v423_v0 = vld [vmem:[%s3090_s12 + $0xb0] sm:$0xff] }
  0x42   : > { %1350 = vmatpush1.bf16.msra.mxu0 %v2775_v63  ;;  %1463 = vmatpush1.bf16.msra.mxu1 %v2778_v3  ;;  %v421_v63 = vld [vmem:[%s3090_s12 + $0xa0] sm:$0xff] }
  0x43   : > { %1351 = vmatprep.subr.bf16.mxu0 %v2783_v4  ;;  %1464 = vmatprep.subr.bf16.mxu1 %v2786_v5  ;;  %v2829_v3 = vld [vmem:[%s3670_s2 + $0x164] ss:$16 sps:$4 sm:$0xff]   ;;  %v2832_v4 = vld [vmem:[%s3670_s2 + $0x16c] ss:$16 sps:$4 sm:$0xff]   ;;  %v2827_v5 = vld [vmem:[%s3670_s2 + $0x160] ss:$16 sps:$4 sm:$0xff]  }
  0x44   : > { %2409 = vmatprep.mubr.msk.bf16.mxu0 %vm799_vm1, %v436_v6  ;;  %2418 = vmatprep.mubr.msk.bf16.mxu1 %vm799_vm1, %v436_v6  ;;  %v2830_v6 = vld [vmem:[%s3670_s2 + $0x168] ss:$16 sps:$4 sm:$0xff]  }
  0x46   : > { %1352 = vmatpush1.bf16.msra.mxu0 %v2781_v7  ;;  %1465 = vmatpush1.bf16.msra.mxu1 %v2784_v8  ;;  %v426_v7 = vld [vmem:[%s3090_s12 + $0xc8] sm:$0xff]  ;;  %v428_v8 = vld [vmem:[%s3090_s12 + $0xd8] sm:$0xff] }
  0x47   : > { %1353 = vmatprep.subr.bf16.mxu0 %v2789_v11  ;;  %1466 = vmatprep.subr.bf16.mxu1 %v2792_v12  ;;  %v443_v11 = vpack.c.bf16 %v423_v0, %v421_v63  ;;  %v2833_v12 = vld [vmem:[%s3670_s2 + $0x140] ss:$16 sps:$4 sm:$0xff]   ;;  %v446_v14 = vpack.c.bf16 %v428_v8, %v426_v7  ;;  %v393_v63 = vpack.c.bf16 %v371_v60, %v369_v59 }
  0x48   : > { %v377_v7 = vld [vmem:[%s3347_s25 + $0xc0] sm:$0xff]  ;;  %v379_v8 = vld [vmem:[%s3347_s25 + $0xd0] sm:$0xff] }
  0x49   : > { %880 = vmatmul.mubr.bf16.gmra.mxu0 %v435_v15  ;;  %993 = vmatmul.mubr.bf16.gmra.mxu1 %v435_v15  ;;  %v2841_v15 = vld [vmem:[%s3670_s2 + $0x124] ss:$16 sps:$4 sm:$0xff]  }
  0x4a   : > { %1354 = vmatpush1.bf16.msra.mxu0 %v2787_v16  ;;  %1467 = vmatpush1.bf16.msra.mxu1 %v2790_v17  ;;  %v2844_v16 = vld [vmem:[%s3670_s2 + $0x12c] ss:$16 sps:$4 sm:$0xff]   ;;  %v425_v17 = vld [vmem:[%s3090_s12 + $0xc0] sm:$0xff] }
  0x4b   : > { %2410 = vmatprep.mubr.msk.bf16.mxu0 %vm799_vm1, %v438_v18  ;;  %2419 = vmatprep.mubr.msk.bf16.mxu1 %vm799_vm1, %v438_v18  ;;  %v427_v18 = vld [vmem:[%s3090_s12 + $0xd0] sm:$0xff] }
  0x4c   : > { %1355 = vmatprep.subr.bf16.mxu0 %v2795_v20  ;;  %1468 = vmatprep.subr.bf16.mxu1 %v2798_v22  ;;  %v432_v20 = vld [vmem:[%s3090_s12 + $0xf8] sm:$0xff] }
  0x4d   : > { %v2842_v22 = vld [vmem:[%s3670_s2 + $0x128] ss:$16 sps:$4 sm:$0xff]  }
  0x4e   : > { %1356 = vmatpush1.bf16.msra.mxu0 %v2793_v19  ;;  %1469 = vmatpush1.bf16.msra.mxu1 %v2796_v21  ;;  %v430_v19 = vld [vmem:[%s3090_s12 + $0xe8] sm:$0xff]  ;;  %v2839_v21 = vld [vmem:[%s3670_s2 + $0x120] ss:$16 sps:$4 sm:$0xff]  }
  0x4f   : > { %1357 = vmatprep.subr.bf16.mxu0 %v2801_v25  ;;  %1470 = vmatprep.subr.bf16.mxu1 %v2804_v26  ;;  %v445_v25 = vpack.c.bf16 %v427_v18, %v425_v17  ;;  %v448_v26 = vpack.c.bf16 %v432_v20, %v430_v19  ;;  %v2853_v17 = vld [vmem:[%s3672_s4 + $0x70] sm:$0xff]   ;;  %v2855_v20 = vld [vmem:[%s3672_s4 + $0x68] sm:$0xff]  }
  0x50   : > { %v2854_v18 = vld [vmem:[%s3672_s4 + $0x30] sm:$0xff]  }
  0x51   : > { %890 = vmatmul.mubr.bf16.gmra.mxu0 %v437_v29  ;;  %1003 = vmatmul.mubr.bf16.gmra.mxu1 %v437_v29  ;;  %v429_v29 = vld [vmem:[%s3090_s12 + $0xe0] sm:$0xff] }
  0x52   : > { %1358 = vmatpush1.bf16.msra.mxu0 %v2799_v30  ;;  %1471 = vmatpush1.bf16.msra.mxu1 %v2802_v31  ;;  %v431_v30 = vld [vmem:[%s3090_s12 + $0xf0] sm:$0xff]  ;;  %v354_v31 = vld [vmem:[%s3347_s25 + $0x8] sm:$0xff] }
  0x53   : > { %2411 = vmatprep.mubr.msk.bf16.mxu0 %vm799_vm1, %v440_v32  ;;  %2420 = vmatprep.mubr.msk.bf16.mxu1 %vm799_vm1, %v440_v32  ;;  %v356_v32 = vld [vmem:[%s3347_s25 + $0x18] sm:$0xff] }
  0x54   : > { %1359 = vmatprep.subr.bf16.mxu0 %v2807_v33  ;;  %1472 = vmatprep.subr.bf16.mxu1 %v2810_v36  ;;  %v447_v33 = vpack.c.bf16 %v431_v30, %v429_v29  ;;  %v386_v34 = vpack.c.bf16 %v356_v32, %v354_v31  ;;  %v355_v36 = vld [vmem:[%s3347_s25 + $0x10] sm:$0xff]  ;;  %v2864_v29 = vld [vmem:[%s3672_s4 + $0x8] sm:$0xff]   ;;  %v2865_v30 = vld [vmem:[%s3672_s4 + $0x40] sm:$0xff]  }
  0x55   : > { %v2866_v31 = vld [vmem:[%s3672_s4] sm:$0xff]  }
  0x56   : > { %1360 = vmatpush1.bf16.msra.mxu0 %v2805_v37  ;;  %1473 = vmatpush1.bf16.msra.mxu1 %v2808_v38  ;;  %v358_v37 = vld [vmem:[%s3347_s25 + $0x28] sm:$0xff]  ;;  %v360_v38 = vld [vmem:[%s3347_s25 + $0x38] sm:$0xff] }
  0x57   : > { %1361 = vmatprep.subr.bf16.mxu0 %v2813_v39  ;;  %1474 = vmatprep.subr.bf16.mxu1 %v2816_v40  ;;  %v385_v39 = vpack.c.bf16 %v355_v36, %v353_v35  ;;  %v388_v40 = vpack.c.bf16 %v360_v38, %v358_v37 }
  0x59   : > { %900 = vmatmul.mubr.bf16.gmra.mxu0 %v439_v43  ;;  %1013 = vmatmul.mubr.bf16.gmra.mxu1 %v439_v43  ;;  %v362_v43 = vld [vmem:[%s3347_s25 + $0x48] sm:$0xff] }
  0x5a   : > { %2412 = vmatprep.mubr.msk.bf16.mxu0 %vm799_vm1, %v442_v44  ;;  %2421 = vmatprep.mubr.msk.bf16.mxu1 %vm799_vm1, %v442_v44  ;;  %v364_v44 = vld [vmem:[%s3347_s25 + $0x58] sm:$0xff] }
  0x5b   : > { %1362 = vmatpush1.bf16.msra.mxu0 %v2811_v45  ;;  %1475 = vmatpush1.bf16.msra.mxu1 %v2814_v46  ;;  %v387_v45 = vpack.c.bf16 %v359_v42, %v357_v41  ;;  %v390_v46 = vpack.c.bf16 %v364_v44, %v362_v43 }
  0x5c   : > { %1363 = vmatprep.subr.bf16.mxu0 %v2819_v47  ;;  %1476 = vmatprep.subr.bf16.mxu1 %v2822_v48  ;;  %v361_v47 = vld [vmem:[%s3347_s25 + $0x40] sm:$0xff]  ;;  %v363_v48 = vld [vmem:[%s3347_s25 + $0x50] sm:$0xff] }
  0x5d   : > { %v389_v51 = vpack.c.bf16 %v363_v48, %v361_v47 }
  0x5f   : > { %1364 = vmatpush1.bf16.msra.mxu0 %v2817_v53  ;;  %1477 = vmatpush1.bf16.msra.mxu1 %v2820_v54  ;;  %v365_v53 = vld [vmem:[%s3347_s25 + $0x60] sm:$0xff]  ;;  %v367_v54 = vld [vmem:[%s3347_s25 + $0x70] sm:$0xff] }
  0x60   : > { %2477 = vmatprep.subr.msk.bf16.mxu0 %vm824_vm0, %v2474_v57  ;;  %2486 = vmatprep.subr.msk.bf16.mxu1 %vm824_vm0, %v2476_v58  ;;  %v391_v57 = vpack.c.bf16 %v367_v54, %v365_v53  ;;  %v394_v58 = vpack.c.bf16 %v372_v56, %v370_v55 }
  0x61   : > { %910 = vmatmul.mubr.bf16.gmra.mxu0 %v441_v61  ;;  %1023 = vmatmul.mubr.bf16.gmra.mxu1 %v441_v61  ;;  %v374_v61 = vld [vmem:[%s3347_s25 + $0xa8] sm:$0xff] }
  0x62   : > { %2413 = vmatprep.mubr.msk.bf16.mxu0 %vm799_vm1, %v444_v62  ;;  %2422 = vmatprep.mubr.msk.bf16.mxu1 %vm799_vm1, %v444_v62  ;;  %v376_v62 = vld [vmem:[%s3347_s25 + $0xb8] sm:$0xff] }
  0x63   : > { %1372 = vmatpush2.bf16.msra.mxu0 %v1338_v1  ;;  %1485 = vmatpush2.bf16.msra.mxu1 %v1344_v2  ;;  %v396_v0 = vpack.c.bf16 %v376_v62, %v374_v61  ;;  %v373_v1 = vld [vmem:[%s3347_s25 + $0xa0] sm:$0xff]  ;;  %v375_v2 = vld [vmem:[%s3347_s25 + $0xb0] sm:$0xff] }
  0x64   : > { %1373 = vmatprep.subr.bf16.mxu0 %v2829_v3  ;;  %1486 = vmatprep.subr.bf16.mxu1 %v2832_v4  ;;  %v378_v3 = vld [vmem:[%s3347_s25 + $0xc8] sm:$0xff]  ;;  %v380_v4 = vld [vmem:[%s3347_s25 + $0xd8] sm:$0xff] }
  0x67   : > { %1374 = vmatpush2.bf16.msra.mxu0 %v2827_v5  ;;  %1487 = vmatpush2.bf16.msra.mxu1 %v2830_v6  ;;  %v395_v5 = vpack.c.bf16 %v375_v2, %v373_v1  ;;  %v398_v6 = vpack.c.bf16 %v380_v4, %v378_v3 }
  0x68   : > { %1375 = vmatprep.subr.bf16.mxu0 %v2835_v9  ;;  %1488 = vmatprep.subr.bf16.mxu1 %v2838_v10  ;;  %v382_v9 = vld [vmem:[%s3347_s25 + $0xe8] sm:$0xff]  ;;  %v384_v10 = vld [vmem:[%s3347_s25 + $0xf8] sm:$0xff] }
  0x69   : > { %920 = vmatmul.mubr.bf16.gmra.mxu0 %v443_v11  ;;  %1033 = vmatmul.mubr.bf16.gmra.mxu1 %v443_v11  ;;  %v397_v11 = vpack.c.bf16 %v379_v8, %v377_v7 }
  0x6a   : > { %2414 = vmatprep.mubr.msk.bf16.mxu0 %vm799_vm1, %v446_v14  ;;  %2423 = vmatprep.mubr.msk.bf16.mxu1 %vm799_vm1, %v446_v14  ;;  %v2852_v14 = vld [vmem:[%s3672_s4 + $0x38] sm:$0xff]  }
  0x6b   : > { %1376 = vmatpush2.bf16.msra.mxu0 %v2833_v12  ;;  %1489 = vmatpush2.bf16.msra.mxu1 %v2836_v13  ;;  %v400_v12 = vpack.c.bf16 %v384_v10, %v382_v9  ;;  %v2851_v13 = vld [vmem:[%s3672_s4 + $0x78] sm:$0xff]  }
  0x6c   : > { %1377 = vmatprep.subr.bf16.mxu0 %v2841_v15  ;;  %1490 = vmatprep.subr.bf16.mxu1 %v2844_v16  ;;  %v381_v15 = vld [vmem:[%s3347_s25 + $0xe0] sm:$0xff]  ;;  %v383_v16 = vld [vmem:[%s3347_s25 + $0xf0] sm:$0xff]  ;;  %s351_s25 = scalar_lea.vmem %s3674_s6, %s2354_s18 }
  0x6d   : > { %v399_v19 = vpack.c.bf16 %v383_v16, %v381_v15 }
  0x6f   : > { %1378 = vmatpush2.bf16.msra.mxu0 %v2839_v21  ;;  %1491 = vmatpush2.bf16.msra.mxu1 %v2842_v22  ;;  %v2856_v21 = vld [vmem:[%s3672_s4 + $0x28] sm:$0xff]   ;;  %v2857_v22 = vld [vmem:[%s3672_s4 + $0x60] sm:$0xff]  }
  0x70   : > { %1379 = vmatprep.subr.bf16.mxu0 %v2847_v23  ;;  %1492 = vmatprep.subr.bf16.mxu1 %v2850_v24  ;;  %v2858_v23 = vld [vmem:[%s3672_s4 + $0x20] sm:$0xff]   ;;  %v2859_v24 = vld [vmem:[%s3672_s4 + $0x58] sm:$0xff]  }
  0x71   : > { %930 = vmatmul.mubr.bf16.gmra.mxu0 %v445_v25  ;;  %1043 = vmatmul.mubr.bf16.gmra.mxu1 %v445_v25  ;;  %v2860_v25 = vld [vmem:[%s3672_s4 + $0x18] sm:$0xff]  }
  0x72   : > { %2415 = vmatprep.mubr.msk.bf16.mxu0 %vm799_vm1, %v448_v26  ;;  %2424 = vmatprep.mubr.msk.bf16.mxu1 %vm799_vm1, %v448_v26  ;;  %v2861_v26 = vld [vmem:[%s3672_s4 + $0x50] sm:$0xff]  }
  0x73   : > { %1380 = vmatpush2.bf16.msra.mxu0 %v2845_v27  ;;  %1493 = vmatpush2.bf16.msra.mxu1 %v2848_v28  ;;  %v2862_v27 = vld [vmem:[%s3672_s4 + $0x10] sm:$0xff]   ;;  %v2863_v28 = vld [vmem:[%s3672_s4 + $0x48] sm:$0xff]  }
  0x74   : > { %2595 = vmatprep.subr.bf16.mxu0 %v2851_v13  ;;  %2659 = vmatprep.subr.bf16.mxu1 %v2851_v13 }
  0x79   : > { %940 = vmatmul.mubr.bf16.gmra.mxu0 %v447_v33  ;;  %1053 = vmatmul.mubr.bf16.gmra.mxu1 %v447_v33 }
  0x7a   : > { %2478 = vmatprep.mubr.msk.bf16.mxu0 %vm799_vm1, %v386_v34  ;;  %2487 = vmatprep.mubr.msk.bf16.mxu1 %vm799_vm1, %v386_v34 }
  0x81   : > { %1382 = vmatmul.mubr.bf16.vlgmr.msra.gmra.mxu0 %v385_v39  ;;  %1495 = vmatmul.mubr.bf16.vlgmr.msra.gmra.mxu1 %v385_v39 }
  0x82   : > { %2479 = vmatprep.mubr.msk.bf16.mxu0 %vm799_vm1, %v388_v40  ;;  %2488 = vmatprep.mubr.msk.bf16.mxu1 %vm799_vm1, %v388_v40 }
  0x83   : > { %2596 = vmatpush3.bf16.msra.mxu0 %v2852_v14  ;;  %2667 = vmatpush3.bf16.msra.mxu1 %v2852_v14 }
  0x84   : > { %2597 = vmatprep.subr.bf16.mxu0 %v2853_v17  ;;  %2660 = vmatprep.subr.bf16.mxu1 %v2853_v17 }
  0x87   : > { %2598 = vmatpush3.bf16.msra.mxu0 %v2854_v18  ;;  %2668 = vmatpush3.bf16.msra.mxu1 %v2854_v18 }
  0x88   : > { %2599 = vmatprep.subr.bf16.mxu0 %v2855_v20  ;;  %2661 = vmatprep.subr.bf16.mxu1 %v2855_v20 }
  0x89   : > { %1392 = vmatmul.mubr.bf16.gmra.mxu0 %v387_v45  ;;  %1505 = vmatmul.mubr.bf16.gmra.mxu1 %v387_v45 }
  0x8a   : > { %2480 = vmatprep.mubr.msk.bf16.mxu0 %vm799_vm1, %v390_v46  ;;  %2489 = vmatprep.mubr.msk.bf16.mxu1 %vm799_vm1, %v390_v46 }
  0x8b   : > { %2600 = vmatpush3.bf16.msra.mxu0 %v2856_v21  ;;  %2669 = vmatpush3.bf16.msra.mxu1 %v2856_v21 }
  0x8c   : > { %2601 = vmatprep.subr.bf16.mxu0 %v2857_v22  ;;  %2662 = vmatprep.subr.bf16.mxu1 %v2857_v22 }
  0x8f   : > { %2602 = vmatpush3.bf16.msra.mxu0 %v2858_v23  ;;  %2670 = vmatpush3.bf16.msra.mxu1 %v2858_v23 }
  0x90   : > { %2603 = vmatprep.subr.bf16.mxu0 %v2859_v24  ;;  %2663 = vmatprep.subr.bf16.mxu1 %v2859_v24 }
  0x91   : > { %1402 = vmatmul.mubr.bf16.gmra.mxu0 %v389_v51  ;;  %1515 = vmatmul.mubr.bf16.gmra.mxu1 %v389_v51 }
  0x92   : > { %2481 = vmatprep.mubr.msk.bf16.mxu0 %vm799_vm1, %v392_v52  ;;  %2490 = vmatprep.mubr.msk.bf16.mxu1 %vm799_vm1, %v392_v52 }
  0x93   : > { %2604 = vmatpush3.bf16.msra.mxu0 %v2860_v25  ;;  %2671 = vmatpush3.bf16.msra.mxu1 %v2860_v25 }
  0x94   : > { %2605 = vmatprep.subr.bf16.mxu0 %v2861_v26  ;;  %2664 = vmatprep.subr.bf16.mxu1 %v2861_v26 }
  0x97   : > { %2606 = vmatpush3.bf16.msra.mxu0 %v2862_v27  ;;  %2672 = vmatpush3.bf16.msra.mxu1 %v2862_v27 }
  0x98   : > { %2607 = vmatprep.subr.bf16.mxu0 %v2863_v28  ;;  %2665 = vmatprep.subr.bf16.mxu1 %v2863_v28 }
  0x99   : > { %1412 = vmatmul.mubr.bf16.gmra.mxu0 %v391_v57  ;;  %1525 = vmatmul.mubr.bf16.gmra.mxu1 %v391_v57 }
  0x9a   : > { %2482 = vmatprep.mubr.msk.bf16.mxu0 %vm799_vm1, %v394_v58  ;;  %2491 = vmatprep.mubr.msk.bf16.mxu1 %vm799_vm1, %v394_v58 }
  0x9b   : > { %2608 = vmatpush3.bf16.msra.mxu0 %v2864_v29  ;;  %2673 = vmatpush3.bf16.msra.mxu1 %v2864_v29 }
  0x9c   : > { %2609 = vmatprep.subr.bf16.mxu0 %v2865_v30  ;;  %2666 = vmatprep.subr.bf16.mxu1 %v2865_v30 }
  0x9f   : > { %2610 = vmatpush3.bf16.msra.mxu0 %v2866_v31  ;;  %2674 = vmatpush3.bf16.msra.mxu1 %v2866_v31 }
  0xa1   : > { %1422 = vmatmul.mubr.bf16.gmra.mxu0 %v393_v63  ;;  %1535 = vmatmul.mubr.bf16.gmra.mxu1 %v393_v63 }
  0xa2   : > { %2483 = vmatprep.mubr.msk.bf16.mxu0 %vm799_vm1, %v396_v0  ;;  %2492 = vmatprep.mubr.msk.bf16.mxu1 %vm799_vm1, %v396_v0 }
  0xa9   : > { %1432 = vmatmul.mubr.bf16.gmra.mxu0 %v395_v5  ;;  %1545 = vmatmul.mubr.bf16.gmra.mxu1 %v395_v5 }
  0xaa   : > { %2484 = vmatprep.mubr.msk.bf16.mxu0 %vm799_vm1, %v398_v6  ;;  %2493 = vmatprep.mubr.msk.bf16.mxu1 %vm799_vm1, %v398_v6 }
  0xb1   : > { %1442 = vmatmul.mubr.bf16.gmra.mxu0 %v397_v11  ;;  %1555 = vmatmul.mubr.bf16.gmra.mxu1 %v397_v11 }
  0xb2   : > { %2485 = vmatprep.mubr.msk.bf16.mxu0 %vm799_vm1, %v400_v12  ;;  %2494 = vmatprep.mubr.msk.bf16.mxu1 %vm799_vm1, %v400_v12 }
  0xb9   : > { %1452 = vmatmul.mubr.bf16.gmra.mxu0 %v399_v19  ;;  %1565 = vmatmul.mubr.bf16.gmra.mxu1 %v399_v19 }
 0x101   : > { %v3449_v32 = vpop.f32.mrf.mxu0  ;;  %v3451_v33 = vpop.f32.mrf.mxu1 }
 0x103   : > { %v3453_v34 = vpop.f32.mrf.mxu0  ;;  %v3455_v35 = vpop.f32.mrf.mxu1 }
 0x105   : > { %v3457_v36 = vpop.f32.mrf.mxu0  ;;  %v3459_v37 = vpop.f32.mrf.mxu1 }
 0x107   : > { %v3461_v38 = vpop.f32.mrf.mxu0  ;;  %v3463_v39 = vpop.f32.mrf.mxu1 }
 0x109   : > { %v3465_v40 = vpop.f32.mrf.mxu0  ;;  %v3467_v41 = vpop.f32.mrf.mxu1 }
 0x10b   : > { %v3469_v42 = vpop.f32.mrf.mxu0  ;;  %v3471_v43 = vpop.f32.mrf.mxu1 }
 0x10d   : > { %v3473_v44 = vpop.f32.mrf.mxu0  ;;  %v3475_v45 = vpop.f32.mrf.mxu1 }
 0x10f   : > { %v3477_v46 = vpop.f32.mrf.mxu0  ;;  %v3479_v47 = vpop.f32.mrf.mxu1 }
 0x111   : > { %v3481_v48 = vpop.f32.mrf.mxu0  ;;  %v3483_v49 = vpop.f32.mrf.mxu1 }
 0x113   : > { %v3485_v50 = vpop.f32.mrf.mxu0  ;;  %v3487_v51 = vpop.f32.mrf.mxu1 }
 0x115   : > { %v3489_v52 = vpop.f32.mrf.mxu0  ;;  %v3491_v53 = vpop.f32.mrf.mxu1 }
 0x117   : > { %v3493_v54 = vpop.f32.mrf.mxu0  ;;  %v3495_v55 = vpop.f32.mrf.mxu1 }
 0x119   : > { %v3497_v56 = vpop.f32.mrf.mxu0  ;;  %v3499_v57 = vpop.f32.mrf.mxu1 }
 0x11b   : > { %v3501_v58 = vpop.f32.mrf.mxu0  ;;  %v3503_v59 = vpop.f32.mrf.mxu1 }
 0x11d   : > { %v3505_v60 = vpop.f32.mrf.mxu0  ;;  %v3507_v61 = vpop.f32.mrf.mxu1 }
 0x11f   : > { %v3509_v62 = vpop.f32.mrf.mxu0  ;;  %v3511_v63 = vpop.f32.mrf.mxu1 }
 0x121   : > { %v3513_v0 = vpop.f32.mrf.mxu0  ;;  %v3515_v1 = vpop.f32.mrf.mxu1 }
 0x123   : > { %v3517_v2 = vpop.f32.mrf.mxu0  ;;  %v3519_v3 = vpop.f32.mrf.mxu1 }
 0x125   : > { %v3521_v4 = vpop.f32.mrf.mxu0  ;;  %v3523_v5 = vpop.f32.mrf.mxu1 }
 0x127   : > { %v3525_v6 = vpop.f32.mrf.mxu0  ;;  %v3527_v7 = vpop.f32.mrf.mxu1 }
 0x129   : > { %v3529_v8 = vpop.f32.mrf.mxu0  ;;  %v3531_v9 = vpop.f32.mrf.mxu1 }
 0x12b   : > { %v3533_v10 = vpop.f32.mrf.mxu0  ;;  %v3535_v11 = vpop.f32.mrf.mxu1 }
 0x12d   : > { %v3537_v12 = vpop.f32.mrf.mxu0  ;;  %v3539_v13 = vpop.f32.mrf.mxu1 }
 0x12f   : > { %v3541_v14 = vpop.f32.mrf.mxu0  ;;  %v3543_v15 = vpop.f32.mrf.mxu1 }
 0x130   : > { %3675 = vst [vmem:[#allocation2_spill] sm:$0xff] %v3541_v14  ;;  %3676 = vst [vmem:[#allocation3_spill] sm:$0xff] %v3543_v15 }
 0x131   : > { %v3545_v16 = vpop.f32.mrf.mxu0  ;;  %v3547_v17 = vpop.f32.mrf.mxu1 }
 0x132   : > { %3677 = vst [vmem:[#allocation4_spill] sm:$0xff] %v3545_v16  ;;  %3678 = vst [vmem:[#allocation5_spill] sm:$0xff] %v3547_v17 }
 0x133   : > { %v3549_v18 = vpop.f32.mrf.mxu0  ;;  %v3551_v19 = vpop.f32.mrf.mxu1 }
 0x134   : > { %3679 = vst [vmem:[#allocation6_spill] sm:$0xff] %v3549_v18  ;;  %3680 = vst [vmem:[#allocation7_spill] sm:$0xff] %v3551_v19 }
 0x135   : > { %v3553_v20 = vpop.f32.mrf.mxu0  ;;  %v3555_v21 = vpop.f32.mrf.mxu1 }
 0x136   : > { %3681 = vst [vmem:[#allocation8_spill] sm:$0xff] %v3553_v20  ;;  %3682 = vst [vmem:[#allocation9_spill] sm:$0xff] %v3555_v21 }
 0x137   : > { %v3557_v22 = vpop.f32.mrf.mxu0  ;;  %v3559_v23 = vpop.f32.mrf.mxu1 }
 0x138   : > { %3683 = vst [vmem:[#allocation10_spill] sm:$0xff] %v3557_v22  ;;  %3684 = vst [vmem:[#allocation11_spill] sm:$0xff] %v3559_v23 }
 0x139   : > { %v3561_v24 = vpop.f32.mrf.mxu0  ;;  %v3563_v25 = vpop.f32.mrf.mxu1 }
 0x13a   : > { %3685 = vst [vmem:[#allocation12_spill] sm:$0xff] %v3561_v24  ;;  %3686 = vst [vmem:[#allocation13_spill] sm:$0xff] %v3563_v25 }
 0x13b   : > { %v3565_v26 = vpop.f32.mrf.mxu0  ;;  %v3567_v27 = vpop.f32.mrf.mxu1 }
 0x13c   : > { %3687 = vst [vmem:[#allocation14_spill] sm:$0xff] %v3565_v26  ;;  %3688 = vst [vmem:[#allocation15_spill] sm:$0xff] %v3567_v27 }
 0x13d   : > { %v3569_v28 = vpop.f32.mrf.mxu0  ;;  %v3571_v29 = vpop.f32.mrf.mxu1 }
 0x13e   : > { %3689 = vst [vmem:[#allocation16_spill] sm:$0xff] %v3569_v28  ;;  %3690 = vst [vmem:[#allocation17_spill] sm:$0xff] %v3571_v29 }
 0x13f   : > { %v3573_v30 = vpop.f32.mrf.mxu0  ;;  %v3575_v31 = vpop.f32.mrf.mxu1 }
 0x140   : > { %3691 = vst [vmem:[#allocation18_spill] sm:$0xff] %v3573_v30  ;;  %3692 = vst [vmem:[#allocation19_spill] sm:$0xff] %v3575_v31 }
 0x141   : > { %v1383_v21 = vpop.f32.mrf.mxu0  ;;  %v1496_v22 = vpop.f32.mrf.mxu1 }
 0x142   : > { %v1384_v23 = vadd.f32 %v1383_v21, %v3449_v32  ;;  %v1497_v24 = vadd.f32 %v1496_v22, %v3451_v33 }
 0x143   : > { %v1385_v20 = vpop.f32.mrf.mxu0  ;;  %v1498_v25 = vpop.f32.mrf.mxu1 }
 0x144   : > { %v1575_v19 = vmul.f32 %v1384_v23, %v1384_v23  ;;  %v1607_v26 = vmul.f32 %v1497_v24, %v1497_v24  ;;  %v1386_v27 = vadd.f32 %v1385_v20, %v3453_v34  ;;  %v1499_v28 = vadd.f32 %v1498_v25, %v3455_v35 }
 0x145   : > { %v1387_v18 = vpop.f32.mrf.mxu0  ;;  %v1500_v29 = vpop.f32.mrf.mxu1 }
 0x146   : > { %v1639_v17 = vadd.f32 %v1607_v26, %v1575_v19  ;;  %v1576_v30 = vmul.f32 %v1386_v27, %v1386_v27  ;;  %v1608_v16 = vmul.f32 %v1499_v28, %v1499_v28  ;;  %v1388_v31 = vadd.f32 %v1387_v18, %v3457_v36 }
 0x147   : > { %v1501_v15 = vadd.f32 %v1500_v29, %v3459_v37  ;;  %v1389_v32 = vpop.f32.mrf.mxu0  ;;  %v1502_v21 = vpop.f32.mrf.mxu1 }
 0x148   : > { %v1640_v33 = vadd.f32 %v1608_v16, %v1576_v30  ;;  %v1577_v22 = vmul.f32 %v1388_v31, %v1388_v31  ;;  %v1390_v23 = vadd.f32 %v1389_v32, %v3461_v38  ;;  %v1503_v24 = vadd.f32 %v1502_v21, %v3463_v39 }
 0x149   : > { %v1609_v34 = vmul.f32 %v1501_v15, %v1501_v15  ;;  %v1393_v20 = vpop.f32.mrf.mxu0  ;;  %v1506_v35 = vpop.f32.mrf.mxu1 }
 0x14a   : > { %v1578_v25 = vmul.f32 %v1390_v23, %v1390_v23  ;;  %v1610_v14 = vmul.f32 %v1503_v24, %v1503_v24  ;;  %v1394_v19 = vadd.f32 %v1393_v20, %v3465_v40  ;;  %v1507_v26 = vadd.f32 %v1506_v35, %v3467_v41 }
 0x14b   : > { %v1641_v36 = vadd.f32 %v1609_v34, %v1577_v22  ;;  %v1395_v18 = vpop.f32.mrf.mxu0  ;;  %v1508_v37 = vpop.f32.mrf.mxu1 }
 0x14c   : > { %v1642_v27 = vadd.f32 %v1610_v14, %v1578_v25  ;;  %v1579_v28 = vmul.f32 %v1394_v19, %v1394_v19  ;;  %v1611_v16 = vmul.f32 %v1507_v26, %v1507_v26  ;;  %v1396_v29 = vadd.f32 %v1395_v18, %v3469_v42 }
 0x14d   : > { %v1671_v38 = vpack.c.bf16 %v1641_v36, %v1639_v17  ;;  %v1509_v39 = vadd.f32 %v1508_v37, %v3471_v43  ;;  %v1397_v15 = vpop.f32.mrf.mxu0  ;;  %v1510_v30 = vpop.f32.mrf.mxu1 }
 0x14e   : > { %v1643_v31 = vadd.f32 %v1611_v16, %v1579_v28  ;;  %v1580_v32 = vmul.f32 %v1396_v29, %v1396_v29  ;;  %v1398_v21 = vadd.f32 %v1397_v15, %v3473_v44  ;;  %v1511_v40 = vadd.f32 %v1510_v30, %v3475_v45 }
 0x14f   : > { %v1612_v41 = vmul.f32 %v1509_v39, %v1509_v39  ;;  %v1399_v22 = vpop.f32.mrf.mxu0  ;;  %v1512_v23 = vpop.f32.mrf.mxu1  ;;  %v1672_v24 = vpack.c.bf16 %v1642_v27, %v1640_v33 }
 0x150   : > { %v1581_v14 = vmul.f32 %v1398_v21, %v1398_v21  ;;  %v1613_v34 = vmul.f32 %v1511_v40, %v1511_v40  ;;  %v1400_v20 = vadd.f32 %v1399_v22, %v3477_v46  ;;  %v1513_v42 = vadd.f32 %v1512_v23, %v3479_v47 }
 0x151   : > { %v1644_v17 = vadd.f32 %v1612_v41, %v1580_v32  ;;  %1847 = vmatprep.mubr.bf16.mxu0 %v1672_v24  ;;  %v1403_v43 = vpop.f32.mrf.mxu0  ;;  %v1516_v35 = vpop.f32.mrf.mxu1 }
 0x152   : > { %v1645_v25 = vadd.f32 %v1613_v34, %v1581_v14  ;;  %v1582_v19 = vmul.f32 %v1400_v20, %v1400_v20  ;;  %v1614_v26 = vmul.f32 %v1513_v42, %v1513_v42  ;;  %v1404_v44 = vadd.f32 %v1403_v43, %v3481_v48  ;;  %1848 = vmatmul.mubr.bf16.vlgmr.msra.gmra.mxu0 %v1671_v38 }
 0x153   : > { %v1517_v45 = vadd.f32 %v1516_v35, %v3483_v49  ;;  %v1405_v36 = vpop.f32.mrf.mxu0  ;;  %v1518_v33 = vpop.f32.mrf.mxu1 }
 0x154   : > { %v1646_v18 = vadd.f32 %v1614_v26, %v1582_v19  ;;  %v1583_v37 = vmul.f32 %v1404_v44, %v1404_v44  ;;  %v1406_v46 = vadd.f32 %v1405_v36, %v3485_v50  ;;  %v1519_v47 = vadd.f32 %v1518_v33, %v3487_v51 }
 0x155   : > { %v1615_v27 = vmul.f32 %v1517_v45, %v1517_v45  ;;  %v1407_v28 = vpop.f32.mrf.mxu0  ;;  %v1520_v16 = vpop.f32.mrf.mxu1  ;;  %v1673_v29 = vpack.c.bf16 %v1645_v25, %v1643_v31 }
 0x156   : > { %v1584_v39 = vmul.f32 %v1406_v46, %v1406_v46  ;;  %v1616_v15 = vmul.f32 %v1519_v47, %v1519_v47  ;;  %v1408_v30 = vadd.f32 %v1407_v28, %v3489_v52  ;;  %v1521_v48 = vadd.f32 %v1520_v16, %v3491_v53 }
 0x157   : > { %v1647_v38 = vadd.f32 %v1615_v27, %v1583_v37  ;;  %v1409_v49 = vpop.f32.mrf.mxu0  ;;  %v1522_v32 = vpop.f32.mrf.mxu1  ;;  %v1674_v21 = vpack.c.bf16 %v1646_v18, %v1644_v17 }
 0x158   : > { %v1648_v40 = vadd.f32 %v1616_v15, %v1584_v39  ;;  %v1585_v41 = vmul.f32 %v1408_v30, %v1408_v30  ;;  %v1617_v22 = vmul.f32 %v1521_v48, %v1521_v48  ;;  %v1410_v50 = vadd.f32 %v1409_v49, %v3493_v54 }
 0x159   : > { %v1523_v51 = vadd.f32 %v1522_v32, %v3495_v55  ;;  %1855 = vmatprep.mubr.bf16.mxu0 %v1674_v21  ;;  %v1413_v23 = vpop.f32.mrf.mxu0  ;;  %v1526_v31 = vpop.f32.mrf.mxu1 }
 0x15a   : > { %v1649_v24 = vadd.f32 %v1617_v22, %v1585_v41  ;;  %v1586_v14 = vmul.f32 %v1410_v50, %v1410_v50  ;;  %v1414_v52 = vadd.f32 %v1413_v23, %v3497_v56  ;;  %v1527_v53 = vadd.f32 %v1526_v31, %v3499_v57  ;;  %1856 = vmatmul.mubr.bf16.gmra.mxu0 %v1673_v29 }
 0x15b   : > { %v1618_v34 = vmul.f32 %v1523_v51, %v1523_v51  ;;  %v1415_v20 = vpop.f32.mrf.mxu0  ;;  %v1528_v42 = vpop.f32.mrf.mxu1 }
 0x15c   : > { %v1587_v17 = vmul.f32 %v1414_v52, %v1414_v52  ;;  %v1619_v43 = vmul.f32 %v1527_v53, %v1527_v53  ;;  %v1416_v35 = vadd.f32 %v1415_v20, %v3501_v58  ;;  %v1529_v54 = vadd.f32 %v1528_v42, %v3503_v59 }
 0x15d   : > { %v1650_v55 = vadd.f32 %v1618_v34, %v1586_v14  ;;  %v1417_v25 = vpop.f32.mrf.mxu0  ;;  %v1530_v19 = vpop.f32.mrf.mxu1  ;;  %v1675_v26 = vpack.c.bf16 %v1649_v24, %v1647_v38 }
 0x15e   : > { %v1651_v44 = vadd.f32 %v1619_v43, %v1587_v17  ;;  %v1588_v45 = vmul.f32 %v1416_v35, %v1416_v35  ;;  %v1620_v36 = vmul.f32 %v1529_v54, %v1529_v54  ;;  %v1418_v56 = vadd.f32 %v1417_v25, %v3505_v60 }
 0x15f   : > { %v1531_v57 = vadd.f32 %v1530_v19, %v3507_v61  ;;  %v1419_v33 = vpop.f32.mrf.mxu0  ;;  %v1532_v18 = vpop.f32.mrf.mxu1  ;;  %v1676_v37 = vpack.c.bf16 %v1650_v55, %v1648_v40 }
 0x160   : > { %v1652_v46 = vadd.f32 %v1620_v36, %v1588_v45  ;;  %v1589_v47 = vmul.f32 %v1418_v56, %v1418_v56  ;;  %v1420_v58 = vadd.f32 %v1419_v33, %v3509_v62  ;;  %v1533_v59 = vadd.f32 %v1532_v18, %v3511_v63 }
 0x161   : > { %v1621_v27 = vmul.f32 %v1531_v57, %v1531_v57  ;;  %1863 = vmatprep.mubr.bf16.mxu0 %v1676_v37  ;;  %v1423_v28 = vpop.f32.mrf.mxu0  ;;  %v1536_v16 = vpop.f32.mrf.mxu1 }
 0x162   : > { %v1590_v29 = vmul.f32 %v1420_v58, %v1420_v58  ;;  %v1622_v39 = vmul.f32 %v1533_v59, %v1533_v59  ;;  %v1424_v15 = vadd.f32 %v1423_v28, %v3513_v0  ;;  %v1537_v60 = vadd.f32 %v1536_v16, %v3515_v1  ;;  %1864 = vmatmul.mubr.bf16.gmra.mxu0 %v1675_v26  ;;  %v3693_v58 = vld [vmem:[#allocation2_spill] sm:$0xff] }
 0x163   : > { %v1653_v61 = vadd.f32 %v1621_v27, %v1589_v47  ;;  %v1425_v30 = vpop.f32.mrf.mxu0  ;;  %v1538_v48 = vpop.f32.mrf.mxu1 }
 0x164   : > { %v1654_v38 = vadd.f32 %v1622_v39, %v1590_v29  ;;  %v1591_v49 = vmul.f32 %v1424_v15, %v1424_v15  ;;  %v1623_v32 = vmul.f32 %v1537_v60, %v1537_v60  ;;  %v1426_v62 = vadd.f32 %v1425_v30, %v3517_v2  ;;  %v3696_v60 = vld [vmem:[#allocation5_spill] sm:$0xff] }
 0x165   : > { %v1539_v63 = vadd.f32 %v1538_v48, %v3519_v3  ;;  %v1427_v21 = vpop.f32.mrf.mxu0  ;;  %v1540_v40 = vpop.f32.mrf.mxu1  ;;  %v1677_v41 = vpack.c.bf16 %v1653_v61, %v1651_v44 }
 0x166   : > { %v1655_v22 = vadd.f32 %v1623_v32, %v1591_v49  ;;  %v1592_v50 = vmul.f32 %v1426_v62, %v1426_v62  ;;  %v1428_v0 = vadd.f32 %v1427_v21, %v3521_v4  ;;  %v1541_v1 = vadd.f32 %v1540_v40, %v3523_v5  ;;  %v3697_v32 = vld [vmem:[#allocation6_spill] sm:$0xff] }
 0x167   : > { %v1624_v51 = vmul.f32 %v1539_v63, %v1539_v63  ;;  %v1429_v23 = vpop.f32.mrf.mxu0  ;;  %v1542_v31 = vpop.f32.mrf.mxu1  ;;  %v1678_v24 = vpack.c.bf16 %v1654_v38, %v1652_v46  ;;  %v3698_v63 = vld [vmem:[#allocation7_spill] sm:$0xff] }
 0x168   : > { %v1593_v14 = vmul.f32 %v1428_v0, %v1428_v0  ;;  %v1625_v52 = vmul.f32 %v1541_v1, %v1541_v1  ;;  %v1430_v53 = vadd.f32 %v1429_v23, %v3525_v6  ;;  %v1543_v2 = vadd.f32 %v1542_v31, %v3527_v7  ;;  %v3700_v31 = vld [vmem:[#allocation9_spill] sm:$0xff] }
 0x169   : > { %v1656_v3 = vadd.f32 %v1624_v51, %v1592_v50  ;;  %1871 = vmatprep.mubr.bf16.mxu0 %v1678_v24  ;;  %v1433_v34 = vpop.f32.mrf.mxu0  ;;  %v1546_v20 = vpop.f32.mrf.mxu1  ;;  %v3699_v51 = vld [vmem:[#allocation8_spill] sm:$0xff] }
 0x16a   : > { %v1657_v42 = vadd.f32 %v1625_v52, %v1593_v14  ;;  %v1594_v17 = vmul.f32 %v1430_v53, %v1430_v53  ;;  %v1626_v43 = vmul.f32 %v1543_v2, %v1543_v2  ;;  %v1434_v4 = vadd.f32 %v1433_v34, %v3529_v8  ;;  %1872 = vmatmul.mubr.bf16.gmra.mxu0 %v1677_v41 }
 0x16b   : > { %v1547_v5 = vadd.f32 %v1546_v20, %v3531_v9  ;;  %v1435_v35 = vpop.f32.mrf.mxu0  ;;  %v1548_v54 = vpop.f32.mrf.mxu1 }
 0x16c   : > { %v1679_v55 = vpack.c.bf16 %v1657_v42, %v1655_v22  ;;  %v1658_v25 = vadd.f32 %v1626_v43, %v1594_v17  ;;  %v1595_v19 = vmul.f32 %v1434_v4, %v1434_v4  ;;  %v1436_v6 = vadd.f32 %v1435_v35, %v3533_v10  ;;  %v3694_v10 = vld [vmem:[#allocation3_spill] sm:$0xff]  ;;  %v3701_v42 = vld [vmem:[#allocation10_spill] sm:$0xff] }
 0x16d   : > { %v1627_v7 = vmul.f32 %v1547_v5, %v1547_v5  ;;  %v1549_v26 = vadd.f32 %v1548_v54, %v3535_v11  ;;  %v1437_v44 = vpop.f32.mrf.mxu0  ;;  %v1550_v45 = vpop.f32.mrf.mxu1  ;;  %v3702_v43 = vld [vmem:[#allocation11_spill] sm:$0xff] }
 0x16e   : > { %v1596_v36 = vmul.f32 %v1436_v6, %v1436_v6  ;;  %v1438_v56 = vadd.f32 %v1437_v44, %v3537_v12  ;;  %v1551_v8 = vadd.f32 %v1550_v45, %v3539_v13  ;;  %v1680_v57 = vpack.c.bf16 %v1658_v25, %v1656_v3  ;;  %v3695_v13 = vld [vmem:[#allocation4_spill] sm:$0xff]  ;;  %v3704_v6 = vld [vmem:[#allocation13_spill] sm:$0xff] }
 0x16f   : > { %v1659_v33 = vadd.f32 %v1627_v7, %v1595_v19  ;;  %v1628_v9 = vmul.f32 %v1549_v26, %v1549_v26  ;;  %v1439_v18 = vpop.f32.mrf.mxu0  ;;  %v1552_v37 = vpop.f32.mrf.mxu1  ;;  %v3703_v25 = vld [vmem:[#allocation12_spill] sm:$0xff] }
 0x170   : > { %v1597_v46 = vmul.f32 %v1438_v56, %v1438_v56  ;;  %v1629_v47 = vmul.f32 %v1551_v8, %v1551_v8  ;;  %v1440_v59 = vadd.f32 %v1439_v18, %v3693_v58  ;;  %v1553_v27 = vadd.f32 %v1552_v37, %v3694_v10  ;;  %1879 = vmatprep.mubr.bf16.mxu1 %v1680_v57  ;;  %v3705_v8 = vld [vmem:[#allocation14_spill] sm:$0xff] }
 0x171   : > { %v1660_v11 = vadd.f32 %v1628_v9, %v1596_v36  ;;  %v1443_v28 = vpop.f32.mrf.mxu0  ;;  %v1556_v16 = vpop.f32.mrf.mxu1  ;;  %1880 = vmatmul.mubr.bf16.vlgmr.msra.gmra.mxu1 %v1679_v55 }
 0x172   : > { %v1661_v29 = vadd.f32 %v1629_v47, %v1597_v46  ;;  %v1598_v12 = vmul.f32 %v1440_v59, %v1440_v59  ;;  %v1630_v39 = vmul.f32 %v1553_v27, %v1553_v27  ;;  %v1444_v15 = vadd.f32 %v1443_v28, %v3695_v13  ;;  %v3707_v27 = vld [vmem:[#allocation16_spill] sm:$0xff]  ;;  %v3708_v28 = vld [vmem:[#allocation17_spill] sm:$0xff] }
 0x173   : > { %v1557_v61 = vadd.f32 %v1556_v16, %v3696_v60  ;;  %v1445_v30 = vpop.f32.mrf.mxu0  ;;  %v1558_v48 = vpop.f32.mrf.mxu1  ;;  %v3709_v60 = vld [vmem:[#allocation18_spill] sm:$0xff] }
 0x174   : > { %v1662_v38 = vadd.f32 %v1630_v39, %v1598_v12  ;;  %v1599_v49 = vmul.f32 %v1444_v15, %v1444_v15  ;;  %v1446_v62 = vadd.f32 %v1445_v30, %v3697_v32  ;;  %v1559_v21 = vadd.f32 %v1558_v48, %v3698_v63  ;;  %v3710_v30 = vld [vmem:[#allocation19_spill] sm:$0xff] }
 0x175   : > { %v1631_v40 = vmul.f32 %v1557_v61, %v1557_v61  ;;  %v1447_v41 = vpop.f32.mrf.mxu0  ;;  %v1560_v22 = vpop.f32.mrf.mxu1  ;;  %v1681_v50 = vpack.c.bf16 %v1661_v29, %v1659_v33  ;;  %v3706_v33 = vld [vmem:[#allocation15_spill] sm:$0xff] }
 0x176   : > { %v1600_v0 = vmul.f32 %v1446_v62, %v1446_v62  ;;  %v1632_v1 = vmul.f32 %v1559_v21, %v1559_v21  ;;  %v1448_v23 = vadd.f32 %v1447_v41, %v3699_v51  ;;  %v1561_v24 = vadd.f32 %v1560_v22, %v3700_v31 }
 0x177   : > { %v1663_v14 = vadd.f32 %v1631_v40, %v1599_v49  ;;  %v1449_v52 = vpop.f32.mrf.mxu0  ;;  %v1562_v53 = vpop.f32.mrf.mxu1  ;;  %v1682_v2 = vpack.c.bf16 %v1662_v38, %v1660_v11 }
 0x178   : > { %v1664_v3 = vadd.f32 %v1632_v1, %v1600_v0  ;;  %v1601_v34 = vmul.f32 %v1448_v23, %v1448_v23  ;;  %v1633_v20 = vmul.f32 %v1561_v24, %v1561_v24  ;;  %v1450_v17 = vadd.f32 %v1449_v52, %v3701_v42 }
 0x179   : > { %v1563_v4 = vadd.f32 %v1562_v53, %v3702_v43  ;;  %1887 = vmatprep.mubr.bf16.mxu1 %v1682_v2  ;;  %v1453_v5 = vpop.f32.mrf.mxu0  ;;  %v1566_v35 = vpop.f32.mrf.mxu1 }
 0x17a   : > { %v1665_v54 = vadd.f32 %v1633_v20, %v1601_v34  ;;  %v1602_v55 = vmul.f32 %v1450_v17, %v1450_v17  ;;  %v1454_v19 = vadd.f32 %v1453_v5, %v3703_v25  ;;  %v1567_v7 = vadd.f32 %v1566_v35, %v3704_v6  ;;  %1888 = vmatmul.mubr.bf16.gmra.mxu1 %v1681_v50 }
 0x17b   : > { %v1634_v26 = vmul.f32 %v1563_v4, %v1563_v4  ;;  %v1455_v44 = vpop.f32.mrf.mxu0  ;;  %v1568_v45 = vpop.f32.mrf.mxu1  ;;  %v2076_v20 = vlaneseq }
 0x17c   : > { %v1603_v36 = vmul.f32 %v1454_v19, %v1454_v19  ;;  %v1635_v56 = vmul.f32 %v1567_v7, %v1567_v7  ;;  %v1456_v57 = vadd.f32 %v1455_v44, %v3705_v8  ;;  %v1569_v9 = vadd.f32 %v1568_v45, %v3706_v33 }
 0x17d   : > { %v1666_v18 = vadd.f32 %v1634_v26, %v1602_v55  ;;  %v1457_v37 = vpop.f32.mrf.mxu0  ;;  %v1570_v46 = vpop.f32.mrf.mxu1  ;;  %v1683_v47 = vpack.c.bf16 %v1665_v54, %v1663_v14  ;;  %v2077_v35 = vshrl.u32 %v2076_v20, 7 }
 0x17e   : > { %v1667_v58 = vadd.f32 %v1635_v56, %v1603_v36  ;;  %v1604_v59 = vmul.f32 %v1456_v57, %v1456_v57  ;;  %v1636_v10 = vmul.f32 %v1569_v9, %v1569_v9  ;;  %v1458_v11 = vadd.f32 %v1457_v37, %v3707_v27 }
 0x17f   : > { %v1571_v16 = vadd.f32 %v1570_v46, %v3708_v28  ;;  %v1459_v29 = vpop.f32.mrf.mxu0  ;;  %v1572_v12 = vpop.f32.mrf.mxu1  ;;  %v1684_v39 = vpack.c.bf16 %v1666_v18, %v1664_v3  ;;  %vm2111_vm2 = vcmp.lt.s32.totalorder %v2077_v35, 6 }
 0x180   : > { %v1668_v13 = vadd.f32 %v1636_v10, %v1604_v59  ;;  %v1605_v15 = vmul.f32 %v1458_v11, %v1458_v11  ;;  %v1460_v61 = vadd.f32 %v1459_v29, %v3709_v60  ;;  %v1573_v48 = vadd.f32 %v1572_v12, %v3710_v30 }
 0x181   : > { %v1637_v38 = vmul.f32 %v1571_v16, %v1571_v16  ;;  %1895 = vmatprep.mubr.bf16.mxu1 %v1684_v39 }
 0x182   : > { %v1606_v49 = vmul.f32 %v1460_v61, %v1460_v61  ;;  %v1638_v32 = vmul.f32 %v1573_v48, %v1573_v48  ;;  %1896 = vmatmul.mubr.bf16.gmra.mxu1 %v1683_v47 }
 0x183   : > { %v1669_v62 = vadd.f32 %v1637_v38, %v1605_v15 }
 0x184   : > { %v1670_v63 = vadd.f32 %v1638_v32, %v1606_v49 }
 0x185   : > { %v1685_v21 = vpack.c.bf16 %v1669_v62, %v1667_v58 }
 0x186   : > { %v1686_v40 = vpack.c.bf16 %v1670_v63, %v1668_v13 }
 0x188   : > { %1903 = vmatprep.mubr.bf16.mxu1 %v1686_v40 }
 0x18a   : > { %1904 = vmatmul.mubr.bf16.gmra.mxu1 %v1685_v21 }
 0x212   : > { %v2611_v41 = vpop.f32.mrf.mxu0 }
 0x214   : > { %v2612_v22 = vpop.f32.mrf.mxu0 }
 0x215   : > { %v2613_v50 = vadd.f32 %v2612_v22, %v2611_v41 }
 0x216   : > { %v2614_v0 = vpop.f32.mrf.mxu0 }
 0x217   : > { %v1912_v1 = vmax.f32 %v2613_v50, 1e-10 }
 0x218   : > { %v2615_v51 = vpop.f32.mrf.mxu0 }
 0x219   : > { %2867 = vlog2.f32 %v1912_v1  ;;  %v2616_v23 = vadd.f32 %v2615_v51, %v2614_v0 }
 0x21a   : > { %v2617_v31 = vpop.f32.mrf.mxu0 }
 0x21b   : > { %v1913_v24 = vmax.f32 %v2616_v23, 1e-10 }
 0x21c   : > { %v2618_v14 = vpop.f32.mrf.mxu0 }
 0x21d   : > { %2869 = vlog2.f32 %v1913_v24  ;;  %v2619_v52 = vadd.f32 %v2618_v14, %v2617_v31 }
 0x21e   : > { %v2620_v53 = vpop.f32.mrf.mxu0 }
 0x21f   : > { %v1914_v2 = vmax.f32 %v2619_v52, 1e-10 }
 0x220   : > { %v2621_v3 = vpop.f32.mrf.mxu0 }
 0x221   : > { %2871 = vlog2.f32 %v1914_v2  ;;  %v2622_v34 = vadd.f32 %v2621_v3, %v2620_v53 }
 0x222   : > { %v2623_v42 = vpop.f32.mrf.mxu0 }
 0x223   : > { %v1915_v17 = vmax.f32 %v2622_v34, 1e-10 }
 0x224   : > { %v2624_v43 = vpop.f32.mrf.mxu0 }
 0x225   : > { %2873 = vlog2.f32 %v1915_v17  ;;  %v2625_v4 = vadd.f32 %v2624_v43, %v2623_v42 }
 0x226   : > { %v2868_v5 = vpop.eup %2867  ;;  %v2626_v54 = vpop.f32.mrf.mxu0 }
 0x227   : > { %v1929_v55 = vmul.f32 0.6931472, %v2868_v5  ;;  %v1916_v25 = vmax.f32 %v2625_v4, 1e-10 }
 0x228   : > { %v2627_v19 = vpop.f32.mrf.mxu0 }
 0x229   : > { %v1960_v6 = vmul.f32 0.4342945, %v1929_v55  ;;  %2875 = vlog2.f32 %v1916_v25  ;;  %v2628_v7 = vadd.f32 %v2627_v19, %v2626_v54 }
 0x22a   : > { %v2870_v26 = vpop.eup %2869  ;;  %v2629_v44 = vpop.f32.mrf.mxu0 }
 0x22b   : > { %v1976_v45 = vmul.f32 10.0, %v1960_v6  ;;  %v1931_v36 = vmul.f32 0.6931472, %v2870_v26  ;;  %v1917_v56 = vmax.f32 %v2628_v7, 1e-10 }
 0x22c   : > { %v2630_v8 = vpop.f32.mrf.mxu0 }
 0x22d   : > { %v2127_v57 = vsel %vm2111_vm2, %v1976_v45, -1e+30  ;;  %v1961_v33 = vmul.f32 0.4342945, %v1931_v36  ;;  %2877 = vlog2.f32 %v1917_v56  ;;  %v2631_v9 = vadd.f32 %v2630_v8, %v2629_v44 }
 0x22e   : > { %v2872_v18 = vpop.eup %2871  ;;  %v2143_v37 = vmax.f32 %v2127_v57, -1e+30  ;;  %v2632_v46 = vpop.f32.mrf.mxu0 }
 0x22f   : > { %v1977_v47 = vmul.f32 10.0, %v1961_v33  ;;  %v1933_v58 = vmul.f32 0.6931472, %v2872_v18  ;;  %v1918_v59 = vmax.f32 %v2631_v9, 1e-10 }
 0x230   : > { %v2147_v10 = vmax.f32 %v2143_v37, -1e+30  ;;  %v2633_v27 = vpop.f32.mrf.mxu0 }
 0x231   : > { %v2551_v11 = vpack.c.bf16 %v1977_v47, %v1976_v45  ;;  %2879 = vlog2.f32 %v1918_v59  ;;  %v2634_v28 = vadd.f32 %v2633_v27, %v2632_v46  ;;  %v2635_v16 = vpop.f32.mrf.mxu1  ;;  %v1962_v39 = vmul.f32 0.4342945, %v1933_v58 }
 0x232   : > { %v2874_v29 = vpop.eup %2873  ;;  %v2151_v12 = vmax.f32 %v2147_v10, -1e+30 }
 0x233   : > { %2552 = vst [vmem:[%s3645_s17] sm:$0xff] %v2551_v11   ;;  %v1935_v13 = vmul.f32 0.6931472, %v2874_v29  ;;  %v1919_v15 = vmax.f32 %v2634_v28, 1e-10  ;;  %v2636_v60 = vpop.f32.mrf.mxu1  ;;  %v1978_v63 = vmul.f32 10.0, %v1962_v39 }
 0x234   : > { %v2155_v61 = vmax.f32 %v2151_v12, -1e+30  ;;  %v2637_v30 = vadd.f32 %v2636_v60, %v2635_v16 }
 0x235   : > { %v1963_v48 = vmul.f32 0.4342945, %v1935_v13  ;;  %2881 = vlog2.f32 %v1919_v15  ;;  %v2638_v38 = vpop.f32.mrf.mxu1 }
 0x236   : > { %v2876_v49 = vpop.eup %2875  ;;  %v2157_v32 = vmax.f32 %v2155_v61, -1e+30  ;;  %v1920_v62 = vmax.f32 %v2637_v30, 1e-10 }
 0x237   : > { %v1979_v21 = vmul.f32 10.0, %v1963_v48  ;;  %v1937_v40 = vmul.f32 0.6931472, %v2876_v49  ;;  %v2639_v41 = vpop.f32.mrf.mxu1 }
 0x238   : > { %v2158_v22 = vrot.slane %v2157_v32, 4  ;;  %2883 = vlog2.f32 %v1920_v62  ;;  %v2640_v50 = vadd.f32 %v2639_v41, %v2638_v38 }
 0x239   : > { %v2556_v0 = vpack.c.bf16 %v1979_v21, %v1978_v63  ;;  %v1964_v24 = vmul.f32 0.4342945, %v1937_v40 }
 0x23a   : > { %v2878_v1 = vpop.eup %2877  ;;  %v2159_v51 = vmax.f32 %v2157_v32, %v2158_v22  ;;  %v1921_v23 = vmax.f32 %v2640_v50, 1e-10  ;;  %v2641_v31 = vpop.f32.mrf.mxu1 }
 0x23b   : > { %2588 = vst [vmem:[%s3645_s17 + $0x8] sm:$0xff] %v2556_v0   ;;  %v1939_v14 = vmul.f32 0.6931472, %v2878_v1  ;;  %v1980_v17 = vmul.f32 10.0, %v1964_v24 }
 0x23c   : > { %v2160_v52 = vrot.slane %v2159_v51, 2  ;;  %2885 = vlog2.f32 %v1921_v23  ;;  %v2642_v53 = vpop.f32.mrf.mxu1 }
 0x23d   : > { %v1965_v2 = vmul.f32 0.4342945, %v1939_v14  ;;  %v2643_v3 = vadd.f32 %v2642_v53, %v2641_v31 }
 0x23e   : > { %v2880_v34 = vpop.eup %2879  ;;  %v2161_v20 = vmax.f32 %v2159_v51, %v2160_v52  ;;  %v2644_v42 = vpop.f32.mrf.mxu1 }
 0x23f   : > { %v1981_v43 = vmul.f32 10.0, %v1965_v2  ;;  %v1941_v4 = vmul.f32 0.6931472, %v2880_v34  ;;  %v1922_v5 = vmax.f32 %v2643_v3, 1e-10 }
 0x240   : > { %v2162_v35 = vrot.slane %v2161_v20, 1  ;;  %v2645_v54 = vpop.f32.mrf.mxu1 }
 0x241   : > { %v2561_v55 = vpack.c.bf16 %v1981_v43, %v1980_v17  ;;  %2887 = vlog2.f32 %v1922_v5  ;;  %v2646_v25 = vadd.f32 %v2645_v54, %v2644_v42  ;;  %v1966_v26 = vmul.f32 0.4342945, %v1941_v4 }
 0x242   : > { %v2882_v19 = vpop.eup %2881  ;;  %v2163_v6 = vmax.f32 %v2161_v20, %v2162_v35  ;;  %v2647_v7 = vpop.f32.mrf.mxu1 }
 0x243   : > { %2589 = vst [vmem:[%s3645_s17 + $0x10] sm:$0xff] %v2561_v55   ;;  %v1943_v44 = vmul.f32 0.6931472, %v2882_v19  ;;  %v1923_v45 = vmax.f32 %v2646_v25, 1e-10  ;;  %v1982_v18 = vmul.f32 10.0, %v1966_v26 }
 0x244   : > { %2164 = vst [vmem:[%s351_s25] sm:$0xff] %v2163_v6  ;;  %v2648_v36 = vpop.f32.mrf.mxu1 }
 0x245   : > { %v2884_v56 = vpop.eup %2883  ;;  %v1967_v8 = vmul.f32 0.4342945, %v1943_v44  ;;  %2889 = vlog2.f32 %v1923_v45  ;;  %v2649_v57 = vadd.f32 %v2648_v36, %v2647_v7 }
 0x246   : > { %v1945_v33 = vmul.f32 0.6931472, %v2884_v56  ;;  %v2650_v9 = vpop.f32.mrf.mxu1 }
 0x247   : > { %v1983_v37 = vmul.f32 10.0, %v1967_v8  ;;  %v1924_v46 = vmax.f32 %v2649_v57, 1e-10 }
 0x248   : > { %v2651_v47 = vpop.f32.mrf.mxu1  ;;  %v1968_v27 = vmul.f32 0.4342945, %v1945_v33 }
 0x249   : > { %v2886_v58 = vpop.eup %2885  ;;  %v2566_v59 = vpack.c.bf16 %v1983_v37, %v1982_v18  ;;  %2891 = vlog2.f32 %v1924_v46  ;;  %v2652_v10 = vadd.f32 %v2651_v47, %v2650_v9 }
 0x24a   : > { %v1947_v11 = vmul.f32 0.6931472, %v2886_v58  ;;  %v2653_v28 = vpop.f32.mrf.mxu1  ;;  %v1984_v15 = vmul.f32 10.0, %v1968_v27 }
 0x24b   : > { %2590 = vst [vmem:[%s3645_s17 + $0x18] sm:$0xff] %v2566_v59   ;;  %v1925_v16 = vmax.f32 %v2652_v10, 1e-10 }
 0x24c   : > { %v1969_v29 = vmul.f32 0.4342945, %v1947_v11  ;;  %v2654_v12 = vpop.f32.mrf.mxu1 }
 0x24d   : > { %2893 = vlog2.f32 %v1925_v16  ;;  %v2655_v39 = vadd.f32 %v2654_v12, %v2653_v28 }
 0x24e   : > { %v2888_v13 = vpop.eup %2887  ;;  %v1985_v60 = vmul.f32 10.0, %v1969_v29  ;;  %v2656_v61 = vpop.f32.mrf.mxu1 }
 0x24f   : > { %v1949_v30 = vmul.f32 0.6931472, %v2888_v13  ;;  %v1926_v48 = vmax.f32 %v2655_v39, 1e-10 }
 0x250   : > { %v2571_v38 = vpack.c.bf16 %v1985_v60, %v1984_v15  ;;  %v2657_v49 = vpop.f32.mrf.mxu1 }
 0x251   : > { %2895 = vlog2.f32 %v1926_v48  ;;  %v2658_v32 = vadd.f32 %v2657_v49, %v2656_v61  ;;  %v1970_v63 = vmul.f32 0.4342945, %v1949_v30 }
 0x252   : > { %v2890_v62 = vpop.eup %2889  ;;  %2591 = vst [vmem:[%s3645_s17 + $0x20] sm:$0xff] %v2571_v38  }
 0x253   : > { %v1951_v21 = vmul.f32 0.6931472, %v2890_v62  ;;  %v1927_v40 = vmax.f32 %v2658_v32, 1e-10  ;;  %v1986_v50 = vmul.f32 10.0, %v1970_v63 }
 0x255   : > { %v1971_v41 = vmul.f32 0.4342945, %v1951_v21  ;;  %2897 = vlog2.f32 %v1927_v40 }
 0x256   : > { %v2892_v22 = vpop.eup %2891 }
 0x257   : > { %v1987_v0 = vmul.f32 10.0, %v1971_v41  ;;  %v1953_v1 = vmul.f32 0.6931472, %v2892_v22 }
 0x259   : > { %v2576_v51 = vpack.c.bf16 %v1987_v0, %v1986_v50  ;;  %v1972_v31 = vmul.f32 0.4342945, %v1953_v1 }
 0x25a   : > { %v2894_v23 = vpop.eup %2893 }
 0x25b   : > { %2592 = vst [vmem:[%s3645_s17 + $0x28] sm:$0xff] %v2576_v51   ;;  %v1955_v24 = vmul.f32 0.6931472, %v2894_v23  ;;  %v1988_v53 = vmul.f32 10.0, %v1972_v31 }
 0x25d   : > { %v1973_v14 = vmul.f32 0.4342945, %v1955_v24 }
 0x25e   : > { %v2896_v52 = vpop.eup %2895 }
 0x25f   : > { %v1989_v2 = vmul.f32 10.0, %v1973_v14  ;;  %v1957_v3 = vmul.f32 0.6931472, %v2896_v52 }
 0x261   : > { %v2581_v34 = vpack.c.bf16 %v1989_v2, %v1988_v53  ;;  %v1974_v42 = vmul.f32 0.4342945, %v1957_v3 }
 0x262   : > { %v2898_v20 = vpop.eup %2897 }
 0x263   : > { %2593 = vst [vmem:[%s3645_s17 + $0x30] sm:$0xff] %v2581_v34   ;;  %v1959_v17 = vmul.f32 0.6931472, %v2898_v20  ;;  %v1990_v4 = vmul.f32 10.0, %v1974_v42 }
 0x265   : > { %v1975_v43 = vmul.f32 0.4342945, %v1959_v17 }
 0x267   : > { %v1991_v5 = vmul.f32 10.0, %v1975_v43 }
 0x269   : > { %v2586_v35 = vpack.c.bf16 %v1991_v5, %v1990_v4 }
 0x26b   : > { %2594 = vst [vmem:[%s3645_s17 + $0x38] sm:$0xff] %v2586_v35  }
 0x26c PF: > { %s17_s23 = sadd.s32 1, %s2921_s23   ;;  %s3711_s21 = smov %s2917_s22 }
 0x26d   : > { %p14_p5 = scmp.ge.s32.totalorder %s17_s23, 4   ;;  %s3712_s22 = smov %s3714_s24 }
 0x26f   :  { %16 = sbr.rel (!%p14_p5) target bundleno = 2 (0x2), region = 93 }

</bundles_post_ra>
